<compile_context>
chip_gen: v7x
topology: tpu7x:2x2x1
jax: 0.10.0
libtpu: 0.0.40
codegen_flags: <defaults>
</compile_context>

<pallas_src>
import collections
import functools

import numpy as np
import jax
import jax.numpy as jnp
from jax.experimental import pallas as pl
from jax.experimental.pallas import tpu as pltpu

_K = 3               # conv kernel size used by the SAC-AE pixel encoder
_PADL = _K - 1       # left column margin for the kw-packed conv1 scratch


def _round_up(x, m):
    return ((x + m - 1) // m) * m


_Geom = collections.namedtuple(
    '_Geom',
    ['OH1', 'OW1', 'Q', 'PH', 'PW', 'OH2', 'OW2', 'R1', 'Cp', 'NPH', 'NPC',
     'SLAB1', 'SLAB2', 'OUT_W', 'KDIM', 'TK', 'shifts1'])


def _geometry(C, H, W, stride, NF):
    OH1 = (H - _K) // stride + 1
    OW1 = (W - _K) // stride + 1
    Q = (_K - 1) // stride
    PH, PW = OH1 + Q, OW1 + Q
    OH2, OW2 = OH1 - (_K - 1), OW1 - (_K - 1)
    R1 = PH * PW
    Cp = _round_up(C, 8)
    NPH = stride * stride
    NPC = NPH * Cp
    SLAB1 = _round_up(R1 + Q * PW + Q, 128)
    SLAB2 = _round_up(_PADL + R1 + (_K - 1) * PW + (_K - 1), 128)
    OUT_W = _round_up(R1, 128)                 # lane-dense kernel-1 output
    KDIM = NF * OUT_W                          # encoder-FC contraction dim
    for cand in (2048, 1024, 512, 256, 128):
        if KDIM % cand == 0:
            TK = cand
            break
    else:
        TK = KDIM
    shifts1 = tuple(sorted({(kh // stride) * PW + (kw // stride)
                            for kh in range(_K) for kw in range(_K)}))
    return _Geom(OH1, OW1, Q, PH, PW, OH2, OW2, R1, Cp, NPH, NPC,
                 SLAB1, SLAB2, OUT_W, KDIM, TK, shifts1)


# ----------------------------------------------------------------------------
# Kernel 1: fused conv stack (conv1 stride-s + ReLU -> conv2 + ReLU)
# ----------------------------------------------------------------------------
def _conv_stack_kernel(ph_ref, w1_ref, b1_ref, w2_ref, b2_ref, h2_ref, h1_scr,
                       *, shifts1, pw, r1, nf, out_w):
    # ---- conv1: shift-grouped, K-packed taps ------------------------------
    # Each dot contracts over n_phase*Cp input channels (all stride phases
    # stacked on sublanes); accumulator starts from the first group's dot.
    s0 = shifts1[0]
    acc1 = jnp.dot(w1_ref[0], ph_ref[0, :, s0:s0 + r1],
                   preferred_element_type=jnp.float32)
    for gi in range(1, len(shifts1)):
        s = shifts1[gi]
        acc1 = acc1 + jnp.dot(w1_ref[gi], ph_ref[0, :, s:s + r1],
                              preferred_element_type=jnp.float32)
    h1 = jnp.maximum(acc1 + b1_ref[...], 0.0)              # (NF, r1) f32

    # ---- stage conv1 activations in VMEM scratch, kw-packed ----------------
    # Copy kw lives at rows [kw*NF, (kw+1)*NF) and is written at column offset
    # (_PADL - kw), so a single packed (3*NF, r1) window read per kh yields all
    # three kw shifts.  Columns past the written range only feed positions the
    # encoder-FC weights zero out, but they must stay finite, so zero them
    # first (every step -> safe under megacore grid splitting).
    h1_scr[:, r1:] = jnp.zeros((_K * nf, h1_scr.shape[1] - r1), jnp.float32)
    for kw in range(_K):
        h1_scr[kw * nf:(kw + 1) * nf, _PADL - kw:_PADL - kw + r1] = h1

    # ---- conv2: kh-grouped dots, each contracting over 3*NF ----------------
    acc2 = None
    for kh in range(_K):
        start = _PADL + kh * pw
        win = h1_scr[:, start:start + r1].astype(w2_ref.dtype)
        part = jnp.dot(w2_ref[kh], win, preferred_element_type=jnp.float32)
        acc2 = part if acc2 is None else acc2 + part
    h2 = jnp.maximum(acc2 + b2_ref[...], 0.0)

    # Lane-dense output block (out_w is a multiple of 128); pad columns carry
    # zero encoder-FC weight but must be finite, so write zeros there.
    h2_ref[0, :, 0:r1] = h2.astype(h2_ref.dtype)
    if out_w > r1:
        h2_ref[0, :, r1:out_w] = jnp.zeros((nf, out_w - r1), h2_ref.dtype)


def _pallas_conv_stack(phases, prep, g):
    B = phases.shape[0]
    NF = prep['b1'].shape[0]
    n_s1 = len(g.shifts1)
    kern = functools.partial(_conv_stack_kernel, shifts1=g.shifts1, pw=g.PW,
                             r1=g.R1, nf=NF, out_w=g.OUT_W)

    w_bytes = ((prep['w1p'].size + prep['w2p'].size) * 2
               + (prep['b1'].size + prep['b2'].size) * 4)
    in_blk = g.NPC * g.SLAB1 * 2
    out_blk = NF * g.OUT_W * 2
    scr_bytes = _K * NF * g.SLAB2 * 4
    vmem = int(min(64 << 20,
                   max(8 << 20,
                       2 * (in_blk + out_blk + w_bytes) + scr_bytes + (2 << 20))))
    flops = 2 * B * g.R1 * (n_s1 * g.NPC * NF + _K * _K * NF * NF)
    bytes_accessed = phases.size * 2 + B * NF * g.OUT_W * 2 + w_bytes

    grid_spec = pltpu.PrefetchScalarGridSpec(
        num_scalar_prefetch=0,
        grid=(B,),
        in_specs=[
            pl.BlockSpec((1, g.NPC, g.SLAB1), lambda b: (b, 0, 0)),
            pl.BlockSpec(prep['w1p'].shape, lambda b: (0, 0, 0)),
            pl.BlockSpec(prep['b1'].shape, lambda b: (0, 0)),
            pl.BlockSpec(prep['w2p'].shape, lambda b: (0, 0, 0)),
            pl.BlockSpec(prep['b2'].shape, lambda b: (0, 0)),
        ],
        out_specs=pl.BlockSpec((1, NF, g.OUT_W), lambda b: (b, 0, 0)),
        scratch_shapes=[pltpu.VMEM((_K * NF, g.SLAB2), jnp.float32)],
    )
    return pl.pallas_call(
        kern,
        out_shape=jax.ShapeDtypeStruct((B, NF, g.OUT_W), jnp.bfloat16),
        grid_spec=grid_spec,
        compiler_params=pltpu.CompilerParams(
            dimension_semantics=("parallel",),
            vmem_limit_bytes=vmem),
        cost_estimate=pl.CostEstimate(flops=int(flops), transcendentals=0,
                                      bytes_accessed=int(bytes_accessed)),
    )(phases, prep['w1p'], prep['b1'], prep['w2p'], prep['b2'])


# ----------------------------------------------------------------------------
# Kernel 2: K-blocked encoder FC + LayerNorm/tanh + trunk + squash/log-prob
# ----------------------------------------------------------------------------
def _head_trunk_kernel(f_ref, ew_ref, eb_ref, gam_ref, beta_ref,
                       w1_ref, b1_ref, w2_ref, b2_ref, w3_ref, b3_ref,
                       noise_ref,
                       mu_ref, pi_ref, logpi_ref, logstd_ref, acc_ref,
                       *, log_std_min, log_std_max, act_dim):
    k = pl.program_id(0)

    # blocked encoder FC: accumulate (B, F) partial products over the
    # conv-native flat-feature contraction dimension.
    part = jnp.dot(f_ref[...], ew_ref[...], preferred_element_type=jnp.float32)

    @pl.when(k == 0)
    def _():
        acc_ref[...] = part

    @pl.when(k > 0)
    def _():
        acc_ref[...] = acc_ref[...] + part

    # finalize on the last contraction step
    @pl.when(k == pl.num_programs(0) - 1)
    def _():
        h = acc_ref[...] + eb_ref[...]
        mean = jnp.mean(h, axis=-1, keepdims=True)
        var = jnp.mean((h - mean) ** 2, axis=-1, keepdims=True)
        hn = (h - mean) * jax.lax.rsqrt(var + 1e-5)
        feat = jnp.tanh(hn * gam_ref[...] + beta_ref[...])

        h1 = jnp.dot(feat.astype(w1_ref.dtype), w1_ref[...],
                     preferred_element_type=jnp.float32) + b1_ref[...]
        h1 = jnp.maximum(h1, 0.0)
        h2 = jnp.dot(h1.astype(w2_ref.dtype), w2_ref[...],
                     preferred_element_type=jnp.float32) + b2_ref[...]
        h2 = jnp.maximum(h2, 0.0)
        out = jnp.dot(h2.astype(w3_ref.dtype), w3_ref[...],
                      preferred_element_type=jnp.float32) + b3_ref[...]

        mu = out[:, :act_dim]
        ls = jnp.tanh(out[:, act_dim:])
        ls = log_std_min + 0.5 * (log_std_max - log_std_min) * (ls + 1.0)

        noise = noise_ref[...]
        pi = mu + noise * jnp.exp(ls)

        log_pi = jnp.sum(-0.5 * noise * noise - ls, axis=-1, keepdims=True)
        log_pi = log_pi - 0.5 * np.log(2.0 * np.pi) * act_dim

        mu_s = jnp.tanh(mu)
        pi_s = jnp.tanh(pi)
        log_pi = log_pi - jnp.sum(
            jnp.log(jnp.maximum(1.0 - pi_s * pi_s, 0.0) + 1e-6),
            axis=-1, keepdims=True)

        mu_ref[...] = mu_s
        pi_ref[...] = pi_s
        logpi_ref[...] = log_pi
        logstd_ref[...] = ls


def _pallas_head_trunk(feats, prep, noise, g, log_std_min, log_std_max):
    B, kdim = feats.shape
    F = prep['enc_w'].shape[1]
    A = noise.shape[1]
    H = prep['t1_w'].shape[1]
    tk = g.TK
    nk = kdim // tk

    kern = functools.partial(_head_trunk_kernel,
                             log_std_min=float(log_std_min),
                             log_std_max=float(log_std_max),
                             act_dim=A)

    def _full(arr):
        nd = arr.ndim
        return pl.BlockSpec(arr.shape, lambda k, _nd=nd: (0,) * _nd)

    w_bytes = (prep['t1_w'].size + prep['t2_w'].size + prep['t3_w'].size) * 2
    small = (prep['enc_b'].size + prep['ln_g'].size + prep['ln_b'].size
             + prep['t1_b'].size + prep['t2_b'].size + prep['t3_b'].size
             + noise.size) * 4
    in_blk = B * tk * 2 + tk * F * 2
    out_bytes = (3 * B * A + B) * 4
    vmem = int(min(64 << 20,
                   max(8 << 20,
                       2 * in_blk + w_bytes + small + B * F * 4
                       + out_bytes + (2 << 20))))
    flops = 2 * B * (kdim * F + F * H + H * H + H * 2 * A)
    transcendentals = B * (F + 6 * A)
    bytes_accessed = (feats.size * 2 + prep['enc_w'].size * 2
                      + w_bytes + small + out_bytes)

    grid_spec = pltpu.PrefetchScalarGridSpec(
        num_scalar_prefetch=0,
        grid=(nk,),
        in_specs=[
            pl.BlockSpec((B, tk), lambda k: (0, k)),
            pl.BlockSpec((tk, F), lambda k: (k, 0)),
            _full(prep['enc_b']), _full(prep['ln_g']), _full(prep['ln_b']),
            _full(prep['t1_w']), _full(prep['t1_b']),
            _full(prep['t2_w']), _full(prep['t2_b']),
            _full(prep['t3_w']), _full(prep['t3_b']),
            _full(noise),
        ],
        out_specs=(
            pl.BlockSpec((B, A), lambda k: (0, 0)),
            pl.BlockSpec((B, A), lambda k: (0, 0)),
            pl.BlockSpec((B, 1), lambda k: (0, 0)),
            pl.BlockSpec((B, A), lambda k: (0, 0)),
        ),
        scratch_shapes=[pltpu.VMEM((B, F), jnp.float32)],
    )
    return pl.pallas_call(
        kern,
        out_shape=(
            jax.ShapeDtypeStruct((B, A), jnp.float32),   # mu (squashed)
            jax.ShapeDtypeStruct((B, A), jnp.float32),   # pi (squashed)
            jax.ShapeDtypeStruct((B, 1), jnp.float32),   # log_pi
            jax.ShapeDtypeStruct((B, A), jnp.float32),   # log_std
        ),
        grid_spec=grid_spec,
        compiler_params=pltpu.CompilerParams(
            dimension_semantics=("arbitrary",),
            vmem_limit_bytes=vmem),
        cost_estimate=pl.CostEstimate(flops=int(flops),
                                      transcendentals=int(transcendentals),
                                      bytes_accessed=int(bytes_accessed)),
    )(feats, prep['enc_w'], prep['enc_b'], prep['ln_g'], prep['ln_b'],
      prep['t1_w'], prep['t1_b'], prep['t2_w'], prep['t2_b'],
      prep['t3_w'], prep['t3_b'], noise)


# ----------------------------------------------------------------------------
# Wrapper-side layout plumbing (obs -> per-batch, phase-stacked, bf16 slabs)
# ----------------------------------------------------------------------------
def _build_phase_slabs(obs, stride, g):
    B, C, H, W = obs.shape
    slabs = []
    for rh in range(stride):
        for rw in range(stride):
            p = obs[:, :, rh::stride, rw::stride]            # (B, C, hh, ww)
            hh = min(p.shape[2], g.PH)
            ww = min(p.shape[3], g.PW)
            p = p[:, :, :hh, :ww]
            p = jnp.pad(p, ((0, 0), (0, 0), (0, g.PH - hh), (0, g.PW - ww)))
            p = p.reshape(B, C, g.PH * g.PW)
            p = jnp.pad(p, ((0, 0), (0, g.Cp - C),
                            (0, g.SLAB1 - g.PH * g.PW)))
            slabs.append(p)
    return jnp.concatenate(slabs, axis=1).astype(jnp.bfloat16)   # (B, NPC, SLAB1)


# ----------------------------------------------------------------------------
# One-time weight preparation (hoisted out of the jitted forward)
# ----------------------------------------------------------------------------
def prepare_actor_params(params, obs_shape, stride):
    C, H, W = obs_shape
    NF = params['conv1_w'].shape[0]
    F = params['enc_fc_w'].shape[1]
    g = _geometry(C, H, W, stride, NF)
    bf = jnp.bfloat16

    # conv1: pack taps by lane shift, all stride phases stacked on K.
    w1 = np.asarray(params['conv1_w'], np.float32)               # (NF, C, 3, 3)
    w1p = np.zeros((len(g.shifts1), NF, g.NPC), np.float32)
    sh_to_idx = {s: i for i, s in enumerate(g.shifts1)}
    for kh in range(_K):
        for kw in range(_K):
            p = (kh % stride) * stride + (kw % stride)
            s = (kh // stride) * g.PW + (kw // stride)
            w1p[sh_to_idx[s], :, p * g.Cp:p * g.Cp + C] = w1[:, :, kh, kw]

    # conv2: pack kw along the contraction axis, grouped by kh.
    w2 = np.asarray(params['conv2_w'], np.float32)               # (NF, NF, 3, 3)
    w2p = np.zeros((_K, NF, _K * NF), np.float32)
    for kh in range(_K):
        for kw in range(_K):
            w2p[kh, :, kw * NF:(kw + 1) * NF] = w2[:, :, kh, kw]

    # encoder FC permuted to the conv-native (NF, OUT_W) layout, zero weights
    # at padded / invalid spatial positions (avoids any crop/transpose).
    we = np.asarray(params['enc_fc_w'], np.float32).reshape(NF, g.OH2, g.OW2, F)
    we_full = np.zeros((NF, g.PH, g.PW, F), np.float32)
    we_full[:, :g.OH2, :g.OW2, :] = we
    we_full = we_full.reshape(NF, g.PH * g.PW, F)
    we_pad = np.zeros((NF, g.OUT_W, F), np.float32)
    we_pad[:, :g.PH * g.PW, :] = we_full
    W_enc = we_pad.reshape(NF * g.OUT_W, F)

    return {
        'w1p': jnp.asarray(w1p, bf),
        'b1': params['conv1_b'].reshape(NF, 1).astype(jnp.float32),
        'w2p': jnp.asarray(w2p, bf),
        'b2': params['conv2_b'].reshape(NF, 1).astype(jnp.float32),
        'enc_w': jnp.asarray(W_enc, bf),
        'enc_b': params['enc_fc_b'].astype(jnp.float32),
        'ln_g': params['ln_g'].astype(jnp.float32),
        'ln_b': params['ln_b'].astype(jnp.float32),
        't1_w': params['t1_w'].astype(bf), 't1_b': params['t1_b'].astype(jnp.float32),
        't2_w': params['t2_w'].astype(bf), 't2_b': params['t2_b'].astype(jnp.float32),
        't3_w': params['t3_w'].astype(bf), 't3_b': params['t3_b'].astype(jnp.float32),
    }


# ----------------------------------------------------------------------------
# Actor forward
# ----------------------------------------------------------------------------
@functools.partial(jax.jit,
                   static_argnames=('log_std_min', 'log_std_max', 'stride'))
def actor_forward(obs, prep, noise, log_std_min, log_std_max, stride):
    B, C, H, W = obs.shape
    NF = prep['b1'].shape[0]
    g = _geometry(C, H, W, stride, NF)

    phases = _build_phase_slabs(obs, stride, g)          # (B, NPC, SLAB1) bf16
    h2 = _pallas_conv_stack(phases, prep, g)             # (B, NF, OUT_W) bf16
    feats = h2.reshape(B, NF * g.OUT_W)                  # free reshape (conv-native)

    # TODO(synk): discrete action_type branch (Categorical sampling) and the
    # non-'pixel' encoder variants (fff_dim multipliers) are not implemented;
    # this reproduces the default continuous / pixel-encoder path.
    # TODO(synk): add lane sub-blocking inside a batch element (with a pad2
    # halo) for very large spatial grids, on top of the per-batch blocking.
    return _pallas_head_trunk(feats, prep, noise, g, log_std_min, log_std_max)


# ----------------------------------------------------------------------------
# Parameters (PyTorch-native layouts) and a pure-JAX reference for checking
# ----------------------------------------------------------------------------
def init_params(key, obs_shape, num_filters, feature_dim, hidden_dim,
                action_dim, stride):
    C, H, W = obs_shape
    g = _geometry(C, H, W, stride, num_filters)
    flat_dim = num_filters * g.OH2 * g.OW2
    ks = jax.random.split(key, 6)

    def nrm(k, shape, fan_in):
        return (jax.random.normal(k, shape) / np.sqrt(fan_in)).astype(jnp.float32)

    return {
        'conv1_w': nrm(ks[0], (num_filters, C, _K, _K), C * _K * _K),
        'conv1_b': jnp.zeros((num_filters,), jnp.float32),
        'conv2_w': nrm(ks[1], (num_filters, num_filters, _K, _K),
                       num_filters * _K * _K),
        'conv2_b': jnp.zeros((num_filters,), jnp.float32),
        'enc_fc_w': nrm(ks[2], (flat_dim, feature_dim), flat_dim),
        'enc_fc_b': jnp.zeros((1, feature_dim), jnp.float32),
        'ln_g': jnp.ones((1, feature_dim), jnp.float32),
        'ln_b': jnp.zeros((1, feature_dim), jnp.float32),
        't1_w': nrm(ks[3], (feature_dim, hidden_dim), feature_dim),
        't1_b': jnp.zeros((1, hidden_dim), jnp.float32),
        't2_w': nrm(ks[4], (hidden_dim, hidden_dim), hidden_dim),
        't2_b': jnp.zeros((1, hidden_dim), jnp.float32),
        # fused (mu | log_std) head: Linear(hidden, 2*A), chunk(2, -1)
        't3_w': nrm(ks[5], (hidden_dim, 2 * action_dim), hidden_dim),
        't3_b': jnp.zeros((1, 2 * action_dim), jnp.float32),
    }


def _reference_forward(obs, params, noise, log_std_min, log_std_max, stride):
    """Plain-JAX mirror of the PyTorch Actor forward.

    Matmul/conv operands are cast to bf16 with f32 accumulation to mirror the
    kernel's MXU precision, so the comparison tolerance can stay tight; all
    elementwise math is f32, exactly as in the kernels.
    """
    bf = jnp.bfloat16
    dn = ('NCHW', 'OIHW', 'NCHW')
    x = jax.lax.conv_general_dilated(obs.astype(bf), params['conv1_w'].astype(bf),
                                     (stride, stride), 'VALID',
                                     dimension_numbers=dn,
                                     preferred_element_type=jnp.float32)
    x = jnp.maximum(x + params['conv1_b'][None, :, None, None], 0.0)
    x = jax.lax.conv_general_dilated(x.astype(bf), params['conv2_w'].astype(bf),
                                     (1, 1), 'VALID', dimension_numbers=dn,
                                     preferred_element_type=jnp.float32)
    x = jnp.maximum(x + params['conv2_b'][None, :, None, None], 0.0)
    h = x.reshape(x.shape[0], -1)
    h = jnp.dot(h.astype(bf), params['enc_fc_w'].astype(bf),
                preferred_element_type=jnp.float32) + params['enc_fc_b']
    mean = h.mean(-1, keepdims=True)
    var = ((h - mean) ** 2).mean(-1, keepdims=True)
    h = (h - mean) * jax.lax.rsqrt(var + 1e-5) * params['ln_g'] + params['ln_b']
    feat = jnp.tanh(h)
    h1 = jnp.maximum(jnp.dot(feat.astype(bf), params['t1_w'].astype(bf),
                             preferred_element_type=jnp.float32)
                     + params['t1_b'], 0.0)
    h2 = jnp.maximum(jnp.dot(h1.astype(bf), params['t2_w'].astype(bf),
                             preferred_element_type=jnp.float32)
                     + params['t2_b'], 0.0)
    out = jnp.dot(h2.astype(bf), params['t3_w'].astype(bf),
                  preferred_element_type=jnp.float32) + params['t3_b']
    A = noise.shape[1]
    mu, ls = out[:, :A], out[:, A:]
    ls = jnp.tanh(ls)
    ls = log_std_min + 0.5 * (log_std_max - log_std_min) * (ls + 1.0)
    pi = mu + noise * jnp.exp(ls)
    log_pi = jnp.sum(-0.5 * noise ** 2 - ls, -1, keepdims=True)
    log_pi = log_pi - 0.5 * np.log(2.0 * np.pi) * A
    mu_s, pi_s = jnp.tanh(mu), jnp.tanh(pi)
    log_pi = log_pi - jnp.sum(
        jnp.log(jnp.maximum(1.0 - pi_s ** 2, 0.0) + 1e-6), -1, keepdims=True)
    return mu_s, pi_s, log_pi, ls


if __name__ == "__main__":
    # small, forward-consistent shapes
    B = 2
    obs_shape = (4, 16, 16)        # (C, H, W); obs is NCHW with batch B
    action_dim = 3
    hidden_dim = 32
    feature_dim = 16
    num_filters = 8
    stride = 2
    log_std_min, log_std_max = -10.0, 2.0

    root = jax.random.PRNGKey(0)
    k_obs, k_par, k_noise = jax.random.split(root, 3)

    obs = jax.random.normal(k_obs, (B,) + obs_shape, dtype=jnp.float32)
    params = init_params(k_par, obs_shape, num_filters, feature_dim,
                         hidden_dim, action_dim, stride)
    prep = prepare_actor_params(params, obs_shape, stride)
    # noise = torch.randn_like(mu) equivalent, generated deterministically
    noise = jax.random.normal(k_noise, (B, action_dim), dtype=jnp.float32)

    outs = actor_forward(obs, prep, noise,
                         log_std_min=log_std_min, log_std_max=log_std_max,
                         stride=stride)
    mu, pi, log_pi, log_std = jax.block_until_ready(outs)

    assert mu.shape == (B, action_dim)
    assert pi.shape == (B, action_dim)
    assert log_pi.shape == (B, 1)
    assert log_std.shape == (B, action_dim)
    for arr in (mu, pi, log_pi, log_std):
        assert bool(jnp.all(jnp.isfinite(arr)))

    # numerical check against a plain-JAX, precision-matched reference
    refs = _reference_forward(obs, params, noise, log_std_min, log_std_max,
                              stride)
    for name, got, want in zip(("mu", "pi", "log_pi", "log_std"),
                               (mu, pi, log_pi, log_std), refs):
        assert bool(jnp.allclose(got, want, rtol=2e-2, atol=2e-2)), (
            "mismatch vs reference", name,
            float(jnp.max(jnp.abs(got - want))))

    print("KERNEL_OK")
</pallas_src>

<mosaic_0001>
module attributes {stable_mosaic.version = 11 : i64} {
  func.func @_conv_stack_kernel(%arg0: i32, %arg1: memref<1x32x128xbf16, #tpu.memory_space<vmem>>, %arg2: memref<4x8x32xbf16, #tpu.memory_space<vmem>>, %arg3: memref<8x1xf32, #tpu.memory_space<vmem>>, %arg4: memref<3x8x24xbf16, #tpu.memory_space<vmem>>, %arg5: memref<8x1xf32, #tpu.memory_space<vmem>>, %arg6: memref<1x8x128xbf16, #tpu.memory_space<vmem>>, %arg7: memref<24x128xf32, #tpu.memory_space<vmem>>) attributes {dimension_semantics = [#tpu.dimension_semantics<parallel>], iteration_bounds = array<i64: 2>, scalar_prefetch = 0 : i64, scratch_operands = 1 : i64, tpu.core_type = #tpu.core_type<tc>, window_params = [{transform_indices = @transform_0, window_bounds = array<i64: 1, 32, 128>}, {pipeline_mode = #tpu.pipeline_mode<synchronous>, transform_indices = @transform_1, window_bounds = array<i64: 4, 8, 32>}, {pipeline_mode = #tpu.pipeline_mode<synchronous>, transform_indices = @transform_2, window_bounds = array<i64: 8, 1>}, {pipeline_mode = #tpu.pipeline_mode<synchronous>, transform_indices = @transform_3, window_bounds = array<i64: 3, 8, 24>}, {pipeline_mode = #tpu.pipeline_mode<synchronous>, transform_indices = @transform_4, window_bounds = array<i64: 8, 1>}, {transform_indices = @transform_5, window_bounds = array<i64: 1, 8, 128>}]} {
    %c0 = arith.constant 0 : index
    %c0_0 = arith.constant 0 : index
    %c0_1 = arith.constant 0 : index
    %0 = vector.load %arg2[%c0, %c0_0, %c0_1] : memref<4x8x32xbf16, #tpu.memory_space<vmem>>, vector<1x8x32xbf16>
    %1 = vector.shape_cast %0 : vector<1x8x32xbf16> to vector<8x32xbf16>
    %c0_2 = arith.constant 0 : index
    %c0_3 = arith.constant 0 : index
    %c0_4 = arith.constant 0 : index
    %2 = vector.load %arg1[%c0_2, %c0_3, %c0_4] : memref<1x32x128xbf16, #tpu.memory_space<vmem>>, vector<1x32x64xbf16>
    %3 = vector.shape_cast %2 : vector<1x32x64xbf16> to vector<32x64xbf16>
    %cst = arith.constant dense<0.000000e+00> : vector<8x64xf32>
    %4 = tpu.matmul %1, %3, %cst {dimension_numbers = #tpu.dot_dimension_numbers<[1], [0], [0], [1], [0, 0, 1, 1], [], []>} : vector<8x32xbf16>, vector<32x64xbf16>, vector<8x64xf32> -> vector<8x64xf32>
    %c1 = arith.constant 1 : index
    %c0_5 = arith.constant 0 : index
    %c0_6 = arith.constant 0 : index
    %5 = vector.load %arg2[%c1, %c0_5, %c0_6] : memref<4x8x32xbf16, #tpu.memory_space<vmem>>, vector<1x8x32xbf16>
    %6 = vector.shape_cast %5 : vector<1x8x32xbf16> to vector<8x32xbf16>
    %c0_7 = arith.constant 0 : index
    %c0_8 = arith.constant 0 : index
    %c1_9 = arith.constant 1 : index
    %7 = vector.load %arg1[%c0_7, %c0_8, %c1_9] : memref<1x32x128xbf16, #tpu.memory_space<vmem>>, vector<1x32x64xbf16>
    %8 = vector.shape_cast %7 : vector<1x32x64xbf16> to vector<32x64xbf16>
    %cst_10 = arith.constant dense<0.000000e+00> : vector<8x64xf32>
    %9 = tpu.matmul %6, %8, %cst_10 {dimension_numbers = #tpu.dot_dimension_numbers<[1], [0], [0], [1], [0, 0, 1, 1], [], []>} : vector<8x32xbf16>, vector<32x64xbf16>, vector<8x64xf32> -> vector<8x64xf32>
    %10 = arith.addf %4, %9 : vector<8x64xf32>
    %c2 = arith.constant 2 : index
    %c0_11 = arith.constant 0 : index
    %c0_12 = arith.constant 0 : index
    %11 = vector.load %arg2[%c2, %c0_11, %c0_12] : memref<4x8x32xbf16, #tpu.memory_space<vmem>>, vector<1x8x32xbf16>
    %12 = vector.shape_cast %11 : vector<1x8x32xbf16> to vector<8x32xbf16>
    %c0_13 = arith.constant 0 : index
    %c0_14 = arith.constant 0 : index
    %c8 = arith.constant 8 : index
    %13 = vector.load %arg1[%c0_13, %c0_14, %c8] : memref<1x32x128xbf16, #tpu.memory_space<vmem>>, vector<1x32x64xbf16>
    %14 = vector.shape_cast %13 : vector<1x32x64xbf16> to vector<32x64xbf16>
    %cst_15 = arith.constant dense<0.000000e+00> : vector<8x64xf32>
    %15 = tpu.matmul %12, %14, %cst_15 {dimension_numbers = #tpu.dot_dimension_numbers<[1], [0], [0], [1], [0, 0, 1, 1], [], []>} : vector<8x32xbf16>, vector<32x64xbf16>, vector<8x64xf32> -> vector<8x64xf32>
    %16 = arith.addf %10, %15 : vector<8x64xf32>
    %c3 = arith.constant 3 : index
    %c0_16 = arith.constant 0 : index
    %c0_17 = arith.constant 0 : index
    %17 = vector.load %arg2[%c3, %c0_16, %c0_17] : memref<4x8x32xbf16, #tpu.memory_space<vmem>>, vector<1x8x32xbf16>
    %18 = vector.shape_cast %17 : vector<1x8x32xbf16> to vector<8x32xbf16>
    %c0_18 = arith.constant 0 : index
    %c0_19 = arith.constant 0 : index
    %c9 = arith.constant 9 : index
    %19 = vector.load %arg1[%c0_18, %c0_19, %c9] : memref<1x32x128xbf16, #tpu.memory_space<vmem>>, vector<1x32x64xbf16>
    %20 = vector.shape_cast %19 : vector<1x32x64xbf16> to vector<32x64xbf16>
    %cst_20 = arith.constant dense<0.000000e+00> : vector<8x64xf32>
    %21 = tpu.matmul %18, %20, %cst_20 {dimension_numbers = #tpu.dot_dimension_numbers<[1], [0], [0], [1], [0, 0, 1, 1], [], []>} : vector<8x32xbf16>, vector<32x64xbf16>, vector<8x64xf32> -> vector<8x64xf32>
    %22 = arith.addf %16, %21 : vector<8x64xf32>
    %c0_21 = arith.constant 0 : index
    %c0_22 = arith.constant 0 : index
    %23 = vector.load %arg3[%c0_21, %c0_22] : memref<8x1xf32, #tpu.memory_space<vmem>>, vector<8x1xf32>
    %24 = vector.broadcast %23 : vector<8x1xf32> to vector<8x64xf32>
    %25 = arith.addf %22, %24 : vector<8x64xf32>
    %cst_23 = arith.constant 0.000000e+00 : f32
    %26 = vector.broadcast %cst_23 : f32 to vector<8x64xf32>
    %27 = arith.maximumf %25, %26 : vector<8x64xf32>
    %cst_24 = arith.constant 0.000000e+00 : f32
    %28 = vector.broadcast %cst_24 : f32 to vector<24x64xf32>
    %c0_25 = arith.constant 0 : index
    %c64 = arith.constant 64 : index
    %29 = vector.load %arg7[%c0_25, %c64] : memref<24x128xf32, #tpu.memory_space<vmem>>, vector<24x64xf32>
    tpu.vector_store %arg7[%c0_25, %c64], %28 {strides = array<i32>} : memref<24x128xf32, #tpu.memory_space<vmem>>, vector<24x64xf32>,
    %c0_26 = arith.constant 0 : index
    %c2_27 = arith.constant 2 : index
    %30 = vector.load %arg7[%c0_26, %c2_27] : memref<24x128xf32, #tpu.memory_space<vmem>>, vector<8x64xf32>
    tpu.vector_store %arg7[%c0_26, %c2_27], %27 {strides = array<i32>} : memref<24x128xf32, #tpu.memory_space<vmem>>, vector<8x64xf32>,
    %c8_28 = arith.constant 8 : index
    %c1_29 = arith.constant 1 : index
    %31 = vector.load %arg7[%c8_28, %c1_29] : memref<24x128xf32, #tpu.memory_space<vmem>>, vector<8x64xf32>
    tpu.vector_store %arg7[%c8_28, %c1_29], %27 {strides = array<i32>} : memref<24x128xf32, #tpu.memory_space<vmem>>, vector<8x64xf32>,
    %c16 = arith.constant 16 : index
    %c0_30 = arith.constant 0 : index
    %32 = vector.load %arg7[%c16, %c0_30] : memref<24x128xf32, #tpu.memory_space<vmem>>, vector<8x64xf32>
    tpu.vector_store %arg7[%c16, %c0_30], %27 {strides = array<i32>} : memref<24x128xf32, #tpu.memory_space<vmem>>, vector<8x64xf32>,
    %c0_31 = arith.constant 0 : index
    %c2_32 = arith.constant 2 : index
    %33 = vector.load %arg7[%c0_31, %c2_32] : memref<24x128xf32, #tpu.memory_space<vmem>>, vector<24x64xf32>
    %34 = arith.truncf %33 : vector<24x64xf32> to vector<24x64xbf16>
    %c0_33 = arith.constant 0 : index
    %c0_34 = arith.constant 0 : index
    %c0_35 = arith.constant 0 : index
    %35 = vector.load %arg4[%c0_33, %c0_34, %c0_35] : memref<3x8x24xbf16, #tpu.memory_space<vmem>>, vector<1x8x24xbf16>
    %36 = vector.shape_cast %35 : vector<1x8x24xbf16> to vector<8x24xbf16>
    %cst_36 = arith.constant dense<0.000000e+00> : vector<8x64xf32>
    %37 = tpu.matmul %36, %34, %cst_36 {dimension_numbers = #tpu.dot_dimension_numbers<[1], [0], [0], [1], [0, 0, 1, 1], [], []>} : vector<8x24xbf16>, vector<24x64xbf16>, vector<8x64xf32> -> vector<8x64xf32>
    %c0_37 = arith.constant 0 : index
    %c10 = arith.constant 10 : index
    %38 = vector.load %arg7[%c0_37, %c10] : memref<24x128xf32, #tpu.memory_space<vmem>>, vector<24x64xf32>
    %39 = arith.truncf %38 : vector<24x64xf32> to vector<24x64xbf16>
    %c1_38 = arith.constant 1 : index
    %c0_39 = arith.constant 0 : index
    %c0_40 = arith.constant 0 : index
    %40 = vector.load %arg4[%c1_38, %c0_39, %c0_40] : memref<3x8x24xbf16, #tpu.memory_space<vmem>>, vector<1x8x24xbf16>
    %41 = vector.shape_cast %40 : vector<1x8x24xbf16> to vector<8x24xbf16>
    %cst_41 = arith.constant dense<0.000000e+00> : vector<8x64xf32>
    %42 = tpu.matmul %41, %39, %cst_41 {dimension_numbers = #tpu.dot_dimension_numbers<[1], [0], [0], [1], [0, 0, 1, 1], [], []>} : vector<8x24xbf16>, vector<24x64xbf16>, vector<8x64xf32> -> vector<8x64xf32>
    %43 = arith.addf %37, %42 : vector<8x64xf32>
    %c0_42 = arith.constant 0 : index
    %c18 = arith.constant 18 : index
    %44 = vector.load %arg7[%c0_42, %c18] : memref<24x128xf32, #tpu.memory_space<vmem>>, vector<24x64xf32>
    %45 = arith.truncf %44 : vector<24x64xf32> to vector<24x64xbf16>
    %c2_43 = arith.constant 2 : index
    %c0_44 = arith.constant 0 : index
    %c0_45 = arith.constant 0 : index
    %46 = vector.load %arg4[%c2_43, %c0_44, %c0_45] : memref<3x8x24xbf16, #tpu.memory_space<vmem>>, vector<1x8x24xbf16>
    %47 = vector.shape_cast %46 : vector<1x8x24xbf16> to vector<8x24xbf16>
    %cst_46 = arith.constant dense<0.000000e+00> : vector<8x64xf32>
    %48 = tpu.matmul %47, %45, %cst_46 {dimension_numbers = #tpu.dot_dimension_numbers<[1], [0], [0], [1], [0, 0, 1, 1], [], []>} : vector<8x24xbf16>, vector<24x64xbf16>, vector<8x64xf32> -> vector<8x64xf32>
    %49 = arith.addf %43, %48 : vector<8x64xf32>
    %c0_47 = arith.constant 0 : index
    %c0_48 = arith.constant 0 : index
    %50 = vector.load %arg5[%c0_47, %c0_48] : memref<8x1xf32, #tpu.memory_space<vmem>>, vector<8x1xf32>
    %51 = vector.broadcast %50 : vector<8x1xf32> to vector<8x64xf32>
    %52 = arith.addf %49, %51 : vector<8x64xf32>
    %cst_49 = arith.constant 0.000000e+00 : f32
    %53 = vector.broadcast %cst_49 : f32 to vector<8x64xf32>
    %54 = arith.maximumf %52, %53 : vector<8x64xf32>
    %55 = arith.truncf %54 : vector<8x64xf32> to vector<8x64xbf16>
    %c0_50 = arith.constant 0 : index
    %c0_51 = arith.constant 0 : index
    %c0_52 = arith.constant 0 : index
    %56 = vector.load %arg6[%c0_50, %c0_51, %c0_52] : memref<1x8x128xbf16, #tpu.memory_space<vmem>>, vector<1x8x64xbf16>
    %57 = vector.shape_cast %56 : vector<1x8x64xbf16> to vector<8x64xbf16>
    %58 = vector.shape_cast %55 : vector<8x64xbf16> to vector<1x8x64xbf16>
    tpu.vector_store %arg6[%c0_50, %c0_51, %c0_52], %58 {strides = array<i32>} : memref<1x8x128xbf16, #tpu.memory_space<vmem>>, vector<1x8x64xbf16>,
    %cst_53 = arith.constant 0.000000e+00 : bf16
    %59 = vector.broadcast %cst_53 : bf16 to vector<8x64xbf16>
    %c0_54 = arith.constant 0 : index
    %c0_55 = arith.constant 0 : index
    %c64_56 = arith.constant 64 : index
    %60 = vector.load %arg6[%c0_54, %c0_55, %c64_56] : memref<1x8x128xbf16, #tpu.memory_space<vmem>>, vector<1x8x64xbf16>
    %61 = vector.shape_cast %60 : vector<1x8x64xbf16> to vector<8x64xbf16>
    %62 = vector.shape_cast %59 : vector<8x64xbf16> to vector<1x8x64xbf16>
    tpu.vector_store %arg6[%c0_54, %c0_55, %c64_56], %62 {strides = array<i32>} : memref<1x8x128xbf16, #tpu.memory_space<vmem>>, vector<1x8x64xbf16>,
    return
  }
  func.func @transform_0(%arg0: i32) -> (i32, i32, i32) {
    %c0_i32 = arith.constant 0 : i32
    %c0_i32_0 = arith.constant 0 : i32
    %c0_i32_1 = arith.constant 0 : i32
    return %arg0, %c0_i32, %c0_i32_0 : i32, i32, i32
  }
  func.func @transform_1(%arg0: i32) -> (i32, i32, i32) {
    %c0_i32 = arith.constant 0 : i32
    %c0_i32_0 = arith.constant 0 : i32
    %c0_i32_1 = arith.constant 0 : i32
    %c0_i32_2 = arith.constant 0 : i32
    return %c0_i32, %c0_i32_0, %c0_i32_1 : i32, i32, i32
  }
  func.func @transform_2(%arg0: i32) -> (i32, i32) {
    %c0_i32 = arith.constant 0 : i32
    %c0_i32_0 = arith.constant 0 : i32
    %c0_i32_1 = arith.constant 0 : i32
    return %c0_i32, %c0_i32_0 : i32, i32
  }
  func.func @transform_3(%arg0: i32) -> (i32, i32, i32) {
    %c0_i32 = arith.constant 0 : i32
    %c0_i32_0 = arith.constant 0 : i32
    %c0_i32_1 = arith.constant 0 : i32
    %c0_i32_2 = arith.constant 0 : i32
    return %c0_i32, %c0_i32_0, %c0_i32_1 : i32, i32, i32
  }
  func.func @transform_4(%arg0: i32) -> (i32, i32) {
    %c0_i32 = arith.constant 0 : i32
    %c0_i32_0 = arith.constant 0 : i32
    %c0_i32_1 = arith.constant 0 : i32
    return %c0_i32, %c0_i32_0 : i32, i32
  }
  func.func @transform_5(%arg0: i32) -> (i32, i32, i32) {
    %c0_i32 = arith.constant 0 : i32
    %c0_i32_0 = arith.constant 0 : i32
    %c0_i32_1 = arith.constant 0 : i32
    return %arg0, %c0_i32, %c0_i32_0 : i32, i32, i32
  }
}

module attributes {stable_mosaic.version = 11 : i64} {
  func.func @_head_trunk_kernel(%arg0: i32, %arg1: memref<2x1024xbf16, #tpu.memory_space<vmem>>, %arg2: memref<1024x16xbf16, #tpu.memory_space<vmem>>, %arg3: memref<1x16xf32, #tpu.memory_space<vmem>>, %arg4: memref<1x16xf32, #tpu.memory_space<vmem>>, %arg5: memref<1x16xf32, #tpu.memory_space<vmem>>, %arg6: memref<16x32xbf16, #tpu.memory_space<vmem>>, %arg7: memref<1x32xf32, #tpu.memory_space<vmem>>, %arg8: memref<32x32xbf16, #tpu.memory_space<vmem>>, %arg9: memref<1x32xf32, #tpu.memory_space<vmem>>, %arg10: memref<32x6xbf16, #tpu.memory_space<vmem>>, %arg11: memref<1x6xf32, #tpu.memory_space<vmem>>, %arg12: memref<2x3xf32, #tpu.memory_space<vmem>>, %arg13: memref<2x3xf32, #tpu.memory_space<vmem>>, %arg14: memref<2x3xf32, #tpu.memory_space<vmem>>, %arg15: memref<2x1xf32, #tpu.memory_space<vmem>>, %arg16: memref<2x3xf32, #tpu.memory_space<vmem>>, %arg17: memref<2x16xf32, #tpu.memory_space<vmem>>) attributes {dimension_semantics = [#tpu.dimension_semantics<arbitrary>], iteration_bounds = array<i64: 1>, scalar_prefetch = 0 : i64, scratch_operands = 1 : i64, tpu.core_type = #tpu.core_type<tc>, window_params = [{transform_indices = @transform_0, window_bounds = array<i64: 2, 1024>}, {transform_indices = @transform_1, window_bounds = array<i64: 1024, 16>}, {pipeline_mode = #tpu.pipeline_mode<synchronous>, transform_indices = @transform_2, window_bounds = array<i64: 1, 16>}, {pipeline_mode = #tpu.pipeline_mode<synchronous>, transform_indices = @transform_3, window_bounds = array<i64: 1, 16>}, {pipeline_mode = #tpu.pipeline_mode<synchronous>, transform_indices = @transform_4, window_bounds = array<i64: 1, 16>}, {pipeline_mode = #tpu.pipeline_mode<synchronous>, transform_indices = @transform_5, window_bounds = array<i64: 16, 32>}, {pipeline_mode = #tpu.pipeline_mode<synchronous>, transform_indices = @transform_6, window_bounds = array<i64: 1, 32>}, {pipeline_mode = #tpu.pipeline_mode<synchronous>, transform_indices = @transform_7, window_bounds = array<i64: 32, 32>}, {pipeline_mode = #tpu.pipeline_mode<synchronous>, transform_indices = @transform_8, window_bounds = array<i64: 1, 32>}, {pipeline_mode = #tpu.pipeline_mode<synchronous>, transform_indices = @transform_9, window_bounds = array<i64: 32, 6>}, {pipeline_mode = #tpu.pipeline_mode<synchronous>, transform_indices = @transform_10, window_bounds = array<i64: 1, 6>}, {pipeline_mode = #tpu.pipeline_mode<synchronous>, transform_indices = @transform_11, window_bounds = array<i64: 2, 3>}, {pipeline_mode = #tpu.pipeline_mode<synchronous>, transform_indices = @transform_12, window_bounds = array<i64: 2, 3>}, {pipeline_mode = #tpu.pipeline_mode<synchronous>, transform_indices = @transform_13, window_bounds = array<i64: 2, 3>}, {pipeline_mode = #tpu.pipeline_mode<synchronous>, transform_indices = @transform_14, window_bounds = array<i64: 2, 1>}, {pipeline_mode = #tpu.pipeline_mode<synchronous>, transform_indices = @transform_15, window_bounds = array<i64: 2, 3>}]} {
    %c0 = arith.constant 0 : index
    %c0_0 = arith.constant 0 : index
    %0 = vector.load %arg1[%c0, %c0_0] : memref<2x1024xbf16, #tpu.memory_space<vmem>>, vector<2x1024xbf16>
    %c0_1 = arith.constant 0 : index
    %c0_2 = arith.constant 0 : index
    %1 = vector.load %arg2[%c0_1, %c0_2] : memref<1024x16xbf16, #tpu.memory_space<vmem>>, vector<1024x16xbf16>
    %cst = arith.constant dense<0.000000e+00> : vector<2x16xf32>
    %2 = tpu.matmul %0, %1, %cst {dimension_numbers = #tpu.dot_dimension_numbers<[1], [0], [0], [1], [0, 0, 1, 1], [], []>} : vector<2x1024xbf16>, vector<1024x16xbf16>, vector<2x16xf32> -> vector<2x16xf32>
    %c0_i32 = arith.constant 0 : i32
    %3 = arith.cmpi eq, %arg0, %c0_i32 : i32
    %4 = arith.extui %3 : i1 to i32
    %c0_i32_3 = arith.constant 0 : i32
    %5 = arith.cmpi ne, %4, %c0_i32_3 : i32
    scf.if %5 {
      %c0_8 = arith.constant 0 : index
      %c0_9 = arith.constant 0 : index
      %12 = vector.load %arg17[%c0_8, %c0_9] : memref<2x16xf32, #tpu.memory_space<vmem>>, vector<2x16xf32>
      tpu.vector_store %arg17[%c0_8, %c0_9], %2 {strides = array<i32>} : memref<2x16xf32, #tpu.memory_space<vmem>>, vector<2x16xf32>,
    } else {
    }
    %c0_i32_4 = arith.constant 0 : i32
    %6 = arith.cmpi sgt, %arg0, %c0_i32_4 : i32
    %7 = arith.extui %6 : i1 to i32
    %c0_i32_5 = arith.constant 0 : i32
    %8 = arith.cmpi ne, %7, %c0_i32_5 : i32
    scf.if %8 {
      %c0_8 = arith.constant 0 : index
      %c0_9 = arith.constant 0 : index
      %12 = vector.load %arg17[%c0_8, %c0_9] : memref<2x16xf32, #tpu.memory_space<vmem>>, vector<2x16xf32>
      %13 = arith.addf %12, %2 : vector<2x16xf32>
      %c0_10 = arith.constant 0 : index
      %c0_11 = arith.constant 0 : index
      %14 = vector.load %arg17[%c0_10, %c0_11] : memref<2x16xf32, #tpu.memory_space<vmem>>, vector<2x16xf32>
      tpu.vector_store %arg17[%c0_10, %c0_11], %13 {strides = array<i32>} : memref<2x16xf32, #tpu.memory_space<vmem>>, vector<2x16xf32>,
    } else {
    }
    %c0_i32_6 = arith.constant 0 : i32
    %9 = arith.cmpi eq, %arg0, %c0_i32_6 : i32
    %10 = arith.extui %9 : i1 to i32
    %c0_i32_7 = arith.constant 0 : i32
    %11 = arith.cmpi ne, %10, %c0_i32_7 : i32
    scf.if %11 {
      %c0_8 = arith.constant 0 : index
      %c0_9 = arith.constant 0 : index
      %12 = vector.load %arg17[%c0_8, %c0_9] : memref<2x16xf32, #tpu.memory_space<vmem>>, vector<2x16xf32>
      %c0_10 = arith.constant 0 : index
      %c0_11 = arith.constant 0 : index
      %13 = vector.load %arg3[%c0_10, %c0_11] : memref<1x16xf32, #tpu.memory_space<vmem>>, vector<1x16xf32>
      %14 = vector.broadcast %13 : vector<1x16xf32> to vector<2x16xf32>
      %15 = arith.addf %12, %14 : vector<2x16xf32>
      %cst_12 = arith.constant dense<0.000000e+00> : vector<2xf32>
      %16 = vector.multi_reduction <add>, %15, %cst_12 [1] : vector<2x16xf32> to vector<2xf32>
      %17 = vector.shape_cast %16 : vector<2xf32> to vector<2x1xf32>
      %cst_13 = arith.constant 1.600000e+01 : f32
      %18 = vector.broadcast %cst_13 : f32 to vector<2x1xf32>
      %19 = arith.divf %17, %18 : vector<2x1xf32>
      %20 = vector.broadcast %19 : vector<2x1xf32> to vector<2x16xf32>
      %21 = arith.subf %15, %20 : vector<2x16xf32>
      %22 = arith.mulf %21, %21 : vector<2x16xf32>
      %cst_14 = arith.constant dense<0.000000e+00> : vector<2xf32>
      %23 = vector.multi_reduction <add>, %22, %cst_14 [1] : vector<2x16xf32> to vector<2xf32>
      %24 = vector.shape_cast %23 : vector<2xf32> to vector<2x1xf32>
      %cst_15 = arith.constant 1.600000e+01 : f32
      %25 = vector.broadcast %cst_15 : f32 to vector<2x1xf32>
      %26 = arith.divf %24, %25 : vector<2x1xf32>
      %27 = vector.broadcast %19 : vector<2x1xf32> to vector<2x16xf32>
      %28 = arith.subf %15, %27 : vector<2x16xf32>
      %cst_16 = arith.constant 9.99999974E-6 : f32
      %29 = vector.broadcast %cst_16 : f32 to vector<2x1xf32>
      %30 = arith.addf %26, %29 : vector<2x1xf32>
      %31 = math.rsqrt %30 : vector<2x1xf32>
      %32 = vector.broadcast %31 : vector<2x1xf32> to vector<2x16xf32>
      %33 = arith.mulf %28, %32 : vector<2x16xf32>
      %c0_17 = arith.constant 0 : index
      %c0_18 = arith.constant 0 : index
      %34 = vector.load %arg4[%c0_17, %c0_18] : memref<1x16xf32, #tpu.memory_space<vmem>>, vector<1x16xf32>
      %35 = vector.broadcast %34 : vector<1x16xf32> to vector<2x16xf32>
      %36 = arith.mulf %33, %35 : vector<2x16xf32>
      %c0_19 = arith.constant 0 : index
      %c0_20 = arith.constant 0 : index
      %37 = vector.load %arg5[%c0_19, %c0_20] : memref<1x16xf32, #tpu.memory_space<vmem>>, vector<1x16xf32>
      %38 = vector.broadcast %37 : vector<1x16xf32> to vector<2x16xf32>
      %39 = arith.addf %36, %38 : vector<2x16xf32>
      %40 = math.tanh %39 : vector<2x16xf32>
      %41 = arith.truncf %40 : vector<2x16xf32> to vector<2x16xbf16>
      %c0_21 = arith.constant 0 : index
      %c0_22 = arith.constant 0 : index
      %42 = vector.load %arg6[%c0_21, %c0_22] : memref<16x32xbf16, #tpu.memory_space<vmem>>, vector<16x32xbf16>
      %cst_23 = arith.constant dense<0.000000e+00> : vector<2x32xf32>
      %43 = tpu.matmul %41, %42, %cst_23 {dimension_numbers = #tpu.dot_dimension_numbers<[1], [0], [0], [1], [0, 0, 1, 1], [], []>} : vector<2x16xbf16>, vector<16x32xbf16>, vector<2x32xf32> -> vector<2x32xf32>
      %c0_24 = arith.constant 0 : index
      %c0_25 = arith.constant 0 : index
      %44 = vector.load %arg7[%c0_24, %c0_25] : memref<1x32xf32, #tpu.memory_space<vmem>>, vector<1x32xf32>
      %45 = vector.broadcast %44 : vector<1x32xf32> to vector<2x32xf32>
      %46 = arith.addf %43, %45 : vector<2x32xf32>
      %cst_26 = arith.constant 0.000000e+00 : f32
      %47 = vector.broadcast %cst_26 : f32 to vector<2x32xf32>
      %48 = arith.maximumf %46, %47 : vector<2x32xf32>
      %49 = arith.truncf %48 : vector<2x32xf32> to vector<2x32xbf16>
      %c0_27 = arith.constant 0 : index
      %c0_28 = arith.constant 0 : index
      %50 = vector.load %arg8[%c0_27, %c0_28] : memref<32x32xbf16, #tpu.memory_space<vmem>>, vector<32x32xbf16>
      %cst_29 = arith.constant dense<0.000000e+00> : vector<2x32xf32>
      %51 = tpu.matmul %49, %50, %cst_29 {dimension_numbers = #tpu.dot_dimension_numbers<[1], [0], [0], [1], [0, 0, 1, 1], [], []>} : vector<2x32xbf16>, vector<32x32xbf16>, vector<2x32xf32> -> vector<2x32xf32>
      %c0_30 = arith.constant 0 : index
      %c0_31 = arith.constant 0 : index
      %52 = vector.load %arg9[%c0_30, %c0_31] : memref<1x32xf32, #tpu.memory_space<vmem>>, vector<1x32xf32>
      %53 = vector.broadcast %52 : vector<1x32xf32> to vector<2x32xf32>
      %54 = arith.addf %51, %53 : vector<2x32xf32>
      %cst_32 = arith.constant 0.000000e+00 : f32
      %55 = vector.broadcast %cst_32 : f32 to vector<2x32xf32>
      %56 = arith.maximumf %54, %55 : vector<2x32xf32>
      %57 = arith.truncf %56 : vector<2x32xf32> to vector<2x32xbf16>
      %c0_33 = arith.constant 0 : index
      %c0_34 = arith.constant 0 : index
      %58 = vector.load %arg10[%c0_33, %c0_34] : memref<32x6xbf16, #tpu.memory_space<vmem>>, vector<32x6xbf16>
      %cst_35 = arith.constant dense<0.000000e+00> : vector<2x6xf32>
      %59 = tpu.matmul %57, %58, %cst_35 {dimension_numbers = #tpu.dot_dimension_numbers<[1], [0], [0], [1], [0, 0, 1, 1], [], []>} : vector<2x32xbf16>, vector<32x6xbf16>, vector<2x6xf32> -> vector<2x6xf32>
      %c0_36 = arith.constant 0 : index
      %c0_37 = arith.constant 0 : index
      %60 = vector.load %arg11[%c0_36, %c0_37] : memref<1x6xf32, #tpu.memory_space<vmem>>, vector<1x6xf32>
      %61 = vector.broadcast %60 : vector<1x6xf32> to vector<2x6xf32>
      %62 = arith.addf %59, %61 : vector<2x6xf32>
      %63 = vector.extract_strided_slice %62 {offsets = [0, 0], sizes = [2, 3], strides = [1, 1]} : vector<2x6xf32> to vector<2x3xf32>
      %64 = vector.extract_strided_slice %62 {offsets = [0, 3], sizes = [2, 3], strides = [1, 1]} : vector<2x6xf32> to vector<2x3xf32>
      %65 = math.tanh %64 : vector<2x3xf32>
      %cst_38 = arith.constant 1.000000e+00 : f32
      %66 = vector.broadcast %cst_38 : f32 to vector<2x3xf32>
      %67 = arith.addf %65, %66 : vector<2x3xf32>
      %cst_39 = arith.constant 6.000000e+00 : f32
      %68 = vector.broadcast %cst_39 : f32 to vector<2x3xf32>
      %69 = arith.mulf %68, %67 : vector<2x3xf32>
      %cst_40 = arith.constant -1.000000e+01 : f32
      %70 = vector.broadcast %cst_40 : f32 to vector<2x3xf32>
      %71 = arith.addf %70, %69 : vector<2x3xf32>
      %c0_41 = arith.constant 0 : index
      %c0_42 = arith.constant 0 : index
      %72 = vector.load %arg12[%c0_41, %c0_42] : memref<2x3xf32, #tpu.memory_space<vmem>>, vector<2x3xf32>
      %73 = math.exp %71 : vector<2x3xf32>
      %74 = arith.mulf %72, %73 : vector<2x3xf32>
      %75 = arith.addf %63, %74 : vector<2x3xf32>
      %cst_43 = arith.constant -5.000000e-01 : f32
      %76 = vector.broadcast %cst_43 : f32 to vector<2x3xf32>
      %77 = arith.mulf %76, %72 : vector<2x3xf32>
      %78 = arith.mulf %77, %72 : vector<2x3xf32>
      %79 = arith.subf %78, %71 : vector<2x3xf32>
      %cst_44 = arith.constant dense<0.000000e+00> : vector<2xf32>
      %80 = vector.multi_reduction <add>, %79, %cst_44 [1] : vector<2x3xf32> to vector<2xf32>
      %81 = vector.shape_cast %80 : vector<2xf32> to vector<2x1xf32>
      %cst_45 = arith.constant 2.75681567 : f32
      %82 = vector.broadcast %cst_45 : f32 to vector<2x1xf32>
      %83 = arith.subf %81, %82 : vector<2x1xf32>
      %84 = math.tanh %63 : vector<2x3xf32>
      %85 = math.tanh %75 : vector<2x3xf32>
      %86 = arith.mulf %85, %85 : vector<2x3xf32>
      %cst_46 = arith.constant 1.000000e+00 : f32
      %87 = vector.broadcast %cst_46 : f32 to vector<2x3xf32>
      %88 = arith.subf %87, %86 : vector<2x3xf32>
      %cst_47 = arith.constant 0.000000e+00 : f32
      %89 = vector.broadcast %cst_47 : f32 to vector<2x3xf32>
      %90 = arith.maximumf %88, %89 : vector<2x3xf32>
      %cst_48 = arith.constant 9.99999997E-7 : f32
      %91 = vector.broadcast %cst_48 : f32 to vector<2x3xf32>
      %92 = arith.addf %90, %91 : vector<2x3xf32>
      %93 = math.log %92 : vector<2x3xf32>
      %cst_49 = arith.constant dense<0.000000e+00> : vector<2xf32>
      %94 = vector.multi_reduction <add>, %93, %cst_49 [1] : vector<2x3xf32> to vector<2xf32>
      %95 = vector.shape_cast %94 : vector<2xf32> to vector<2x1xf32>
      %96 = arith.subf %83, %95 : vector<2x1xf32>
      %c0_50 = arith.constant 0 : index
      %c0_51 = arith.constant 0 : index
      %97 = vector.load %arg13[%c0_50, %c0_51] : memref<2x3xf32, #tpu.memory_space<vmem>>, vector<2x3xf32>
      tpu.vector_store %arg13[%c0_50, %c0_51], %84 {strides = array<i32>} : memref<2x3xf32, #tpu.memory_space<vmem>>, vector<2x3xf32>,
      %c0_52 = arith.constant 0 : index
      %c0_53 = arith.constant 0 : index
      %98 = vector.load %arg14[%c0_52, %c0_53] : memref<2x3xf32, #tpu.memory_space<vmem>>, vector<2x3xf32>
      tpu.vector_store %arg14[%c0_52, %c0_53], %85 {strides = array<i32>} : memref<2x3xf32, #tpu.memory_space<vmem>>, vector<2x3xf32>,
      %c0_54 = arith.constant 0 : index
      %c0_55 = arith.constant 0 : index
      %99 = vector.load %arg15[%c0_54, %c0_55] : memref<2x1xf32, #tpu.memory_space<vmem>>, vector<2x1xf32>
      tpu.vector_store %arg15[%c0_54, %c0_55], %96 {strides = array<i32>} : memref<2x1xf32, #tpu.memory_space<vmem>>, vector<2x1xf32>,
      %c0_56 = arith.constant 0 : index
      %c0_57 = arith.constant 0 : index
      %100 = vector.load %arg16[%c0_56, %c0_57] : memref<2x3xf32, #tpu.memory_space<vmem>>, vector<2x3xf32>
      tpu.vector_store %arg16[%c0_56, %c0_57], %71 {strides = array<i32>} : memref<2x3xf32, #tpu.memory_space<vmem>>, vector<2x3xf32>,
    } else {
    }
    return
  }
  func.func @transform_0(%arg0: i32) -> (i32, i32) {
    %c0_i32 = arith.constant 0 : i32
    %c0_i32_0 = arith.constant 0 : i32
    return %c0_i32, %arg0 : i32, i32
  }
  func.func @transform_1(%arg0: i32) -> (i32, i32) {
    %c0_i32 = arith.constant 0 : i32
    %c0_i32_0 = arith.constant 0 : i32
    return %arg0, %c0_i32 : i32, i32
  }
  func.func @transform_2(%arg0: i32) -> (i32, i32) {
    %c0_i32 = arith.constant 0 : i32
    %c0_i32_0 = arith.constant 0 : i32
    %c0_i32_1 = arith.constant 0 : i32
    return %c0_i32, %c0_i32_0 : i32, i32
  }
  func.func @transform_3(%arg0: i32) -> (i32, i32) {
    %c0_i32 = arith.constant 0 : i32
    %c0_i32_0 = arith.constant 0 : i32
    %c0_i32_1 = arith.constant 0 : i32
    return %c0_i32, %c0_i32_0 : i32, i32
  }
  func.func @transform_4(%arg0: i32) -> (i32, i32) {
    %c0_i32 = arith.constant 0 : i32
    %c0_i32_0 = arith.constant 0 : i32
    %c0_i32_1 = arith.constant 0 : i32
    return %c0_i32, %c0_i32_0 : i32, i32
  }
  func.func @transform_5(%arg0: i32) -> (i32, i32) {
    %c0_i32 = arith.constant 0 : i32
    %c0_i32_0 = arith.constant 0 : i32
    %c0_i32_1 = arith.constant 0 : i32
    return %c0_i32, %c0_i32_0 : i32, i32
  }
  func.func @transform_6(%arg0: i32) -> (i32, i32) {
    %c0_i32 = arith.constant 0 : i32
    %c0_i32_0 = arith.constant 0 : i32
    %c0_i32_1 = arith.constant 0 : i32
    return %c0_i32, %c0_i32_0 : i32, i32
  }
  func.func @transform_7(%arg0: i32) -> (i32, i32) {
    %c0_i32 = arith.constant 0 : i32
    %c0_i32_0 = arith.constant 0 : i32
    %c0_i32_1 = arith.constant 0 : i32
    return %c0_i32, %c0_i32_0 : i32, i32
  }
  func.func @transform_8(%arg0: i32) -> (i32, i32) {
    %c0_i32 = arith.constant 0 : i32
    %c0_i32_0 = arith.constant 0 : i32
    %c0_i32_1 = arith.constant 0 : i32
    return %c0_i32, %c0_i32_0 : i32, i32
  }
  func.func @transform_9(%arg0: i32) -> (i32, i32) {
    %c0_i32 = arith.constant 0 : i32
    %c0_i32_0 = arith.constant 0 : i32
    %c0_i32_1 = arith.constant 0 : i32
    return %c0_i32, %c0_i32_0 : i32, i32
  }
  func.func @transform_10(%arg0: i32) -> (i32, i32) {
    %c0_i32 = arith.constant 0 : i32
    %c0_i32_0 = arith.constant 0 : i32
    %c0_i32_1 = arith.constant 0 : i32
    return %c0_i32, %c0_i32_0 : i32, i32
  }
  func.func @transform_11(%arg0: i32) -> (i32, i32) {
    %c0_i32 = arith.constant 0 : i32
    %c0_i32_0 = arith.constant 0 : i32
    %c0_i32_1 = arith.constant 0 : i32
    return %c0_i32, %c0_i32_0 : i32, i32
  }
  func.func @transform_12(%arg0: i32) -> (i32, i32) {
    %c0_i32 = arith.constant 0 : i32
    %c0_i32_0 = arith.constant 0 : i32
    %c0_i32_1 = arith.constant 0 : i32
    return %c0_i32, %c0_i32_0 : i32, i32
  }
  func.func @transform_13(%arg0: i32) -> (i32, i32) {
    %c0_i32 = arith.constant 0 : i32
    %c0_i32_0 = arith.constant 0 : i32
    %c0_i32_1 = arith.constant 0 : i32
    return %c0_i32, %c0_i32_0 : i32, i32
  }
  func.func @transform_14(%arg0: i32) -> (i32, i32) {
    %c0_i32 = arith.constant 0 : i32
    %c0_i32_0 = arith.constant 0 : i32
    %c0_i32_1 = arith.constant 0 : i32
    return %c0_i32, %c0_i32_0 : i32, i32
  }
  func.func @transform_15(%arg0: i32) -> (i32, i32) {
    %c0_i32 = arith.constant 0 : i32
    %c0_i32_0 = arith.constant 0 : i32
    %c0_i32_1 = arith.constant 0 : i32
    return %c0_i32, %c0_i32_0 : i32, i32
  }
}

</mosaic_0001>

<bundles_post_ra>
// kernel: actor_forward.2
= control target key start
LH: loop header
LB: loop body
LE: loop exit
PB: predicated region body
PF: predicated region fallthrough
CT: control target
= control target key end

     0   :  { %s872_s18 = smov 0   ;;  %s963_s0 = inlined_call_operand.vmem [shape: bf16[2,32,128], index: 0, kind: input, shape index: {}]   ;;  %s964_s1 = inlined_call_operand.vmem [shape: bf16[4,8,32], index: 1, kind: input, shape index: {}]   ;;  %s965_s2 = inlined_call_operand.vmem [shape: f32[8,1], index: 2, kind: input, shape index: {}]   ;;  %s966_s3 = inlined_call_operand.vmem [shape: bf16[3,8,24], index: 3, kind: input, shape index: {}]   ;;  %s967_s4 = inlined_call_operand.vmem [shape: f32[8,1], index: 4, kind: input, shape index: {}]   ;;  %s968_s5 = inlined_call_operand.vmem [shape: bf16[2,8,128], index: 5, kind: output, shape index: {}]  }
   0x1 LB: > { %s699_s19 = sadd.s32 4294967295, %s829_s18   ;;  %p703_p0 = scmp.ge.s32.totalorder %s829_s18, 1  ;;  %s829_s18 = sphi %s872_s18, %s15_s18  }
   0x2   : > { %p187_p1 = scmp.lt.s32.totalorder %s829_s18, 3 }
   0x4   : > { %p188_p2 = pnand %p703_p0, %p187_p1 }
   0x5   : > { %p214_p3 = scmp.lt.s32.totalorder (!%p188_p2), %s699_s19, 1  ;;  %v831_v0 = vmov (!%p188_p2), 0.0   ;;  %vm832_vm0 = vmmov (!%p188_p2), 0   ;;  %s833_s24 = smov (!%p188_p2), 127   ;;  %v835_v3 = vmov (!%p188_p2), 0   ;;  %vm247_vm1 = vcmask (!%p188_p2), 261120  }
   0x6   : > { %191 = sbr.rel (%p188_p2) target bundleno = 848 (0x350), region = 40  ;;  %753 = vmatprep.subr.bf16.mxu1 (!%p188_p2), %v831_v0  ;;  %745 = vmatprep.subr.bf16.mxu0 (!%p188_p2), %v831_v0  ;;  %s834_s25 = smov (!%p188_p2), 120   ;;  %v224_v4 = vld [vmem:[%s964_s1] sm:$0xf] (!%p188_p2)  ;;  %v707_v10 = vld [vmem:[%s964_s1 + $0x4] sm:$0xf] (!%p188_p2) }
   0x7   : > { %757 = vmatprep.mubr.msk.bf16.mxu1 (!%p188_p2), %vm832_vm0, %v831_v0  ;;  %749 = vmatprep.mubr.msk.bf16.mxu0 (!%p188_p2), %vm832_vm0, %v831_v0  ;;  %s836_s26 = smov (!%p188_p2), 119   ;;  %v440_v5 = vld [vmem:[%s965_s2] sm:$0xff] (!%p188_p2)  ;;  %v714_v12 = vld [vmem:[%s964_s1 + $0xc] sm:$0xf] (!%p188_p2)  ;;  %v712_v14 = vld [vmem:[%s964_s1 + $0x8] sm:$0xf] (!%p188_p2) }
   0x8   : > { %820 = vset.pattern.permute.xlu0 (!%p188_p2), %v835_v3  ;;  %vm448_vm2 = vcmask (!%p188_p2), 1048064   ;;  %vm463_vm3 = vcmask (!%p188_p2), 523264   ;;  %s837_s12 = smov (!%p188_p2), 2   ;;  %s838_s13 = smov (!%p188_p2), 1   ;;  %vm456_vm4 = vcmask (!%p188_p2), 539664   ;;  %vm461_vm5 = vcmask (!%p188_p2), 531464  }
   0x9   : > { %451 = vst.msk [vmem:[#allocation2 + $0x10] sm:$0xff] (!%p188_p2), %vm448_vm2, %v831_v0  ;;  %449 = vst.msk [vmem:[#allocation2] sm:$0xff] (!%p188_p2), %vm448_vm2, %v831_v0  ;;  %s839_s14 = smov (!%p188_p2), 118   ;;  %s840_s15 = smov (!%p188_p2), 110   ;;  %v633_v44 = vld [vmem:[%s967_s4] sm:$0xff] (!%p188_p2)  ;;  %vm484_vm6 = vcmask (!%p188_p2), 1043456  }
   0xa   : > { %450 = vst.msk [vmem:[#allocation2 + $0x8] sm:$0xff] (!%p188_p2), %vm448_vm2, %v831_v0  ;;  %s841_s16 = smov (!%p188_p2), 126   ;;  %v716_v50 = vld [vmem:[%s966_s3 + $0x4] sm:$0xf] (!%p188_p2)  ;;  %vm480_vm7 = vcmask (!%p188_p2), 195584   ;;  %vm642_vm8 = vcmask (!%p188_p2), 519168  }
   0xb   : > { %v470_v54 = vld [vmem:[%s966_s3] sm:$0xf] (!%p188_p2)  ;;  %v719_v56 = vld [vmem:[%s966_s3 + $0x8] sm:$0xf] (!%p188_p2)  ;;  %vm644_vm9 = vcmask (!%p188_p2), 1043968  }
   0xd   : > { %s970_s19 = smov (!%p214_p3, %s699_s19), 1 }
   0xe   : > { %s723_s20 = sshll.u32 %s970_s19, 4  ;;  %s706_s27 = sshll.u32 %s970_s19, 2 }
   0xf   : > { %s218_s23 = scalar_lea.vmem %s963_s0, %s723_s20  ;;  %s222_s30 = scalar_lea.vmem %s968_s5, %s706_s27 }
  0x10   : > { %v821_v1 = vld [vmem:[%s218_s23] sm:$0xff]   ;;  %v822_v2 = vld [vmem:[%s218_s23 + $0x8] sm:$0xff]  }
  0x11   : > { %241 = vrot.lane.b32.xlu0 %v821_v1, %s833_s24  ;;  %338 = vrot.lane.b32.xlu1 %v821_v1, %s834_s25 }
  0x12   : > { %754 = vmatpush3.bf16.msra.mxu1 %v821_v1 }
  0x13   : > { %755 = vmatprep.subr.bf16.mxu1 %v831_v0 }
  0x15   : > { %243 = vrot.lane.b32.xlu0 %v822_v2, %s833_s24  ;;  %390 = vrot.lane.b32.xlu1 %v821_v1, %s836_s26 }
  0x16   : > { %756 = vmatpush3.bf16.msra.mxu1 %v822_v2 }
  0x17   : > { %769 = vmatprep.subr.bf16.mxu1 %v831_v0 }
  0x19   : > { %392 = vrot.lane.b32.xlu1 %v822_v2, %s836_s26  ;;  %340 = vrot.lane.b32.xlu0 %v822_v2, %s834_s25 }
  0x1a   : > { %758 = vmatmul.mubr.msk.bf16.vlgmr.msra.gmra.mrb[0].mxu1 %vm247_vm1, %v224_v4 }
  0x1b   : > { %773 = vmatprep.mubr.msk.bf16.mxu1 %vm832_vm0, %v831_v0 }
  0x1d   : > { %443 = vperm.xlu0 %820, %v440_v5  }
  0x83   : > { %v242_v6 = vpop.permute.xlu0 %241  ;;  %v339_v7 = vpop.permute.xlu1 %338 }
  0x84   : > { %746 = vmatpush3.bf16.msra.mxu0 %v242_v6 }
  0x85   : > { %747 = vmatprep.subr.bf16.mxu0 %v831_v0 }
  0x87   : > { %v244_v8 = vpop.permute.xlu0 %243  ;;  %v391_v9 = vpop.permute.xlu1 %390 }
  0x88   : > { %748 = vmatpush3.bf16.msra.mxu0 %v244_v8  ;;  %770 = vmatpush3.bf16.msra.mxu1 %v391_v9 }
  0x89   : > { %761 = vmatprep.subr.bf16.mxu0 %v831_v0  ;;  %771 = vmatprep.subr.bf16.mxu1 %v831_v0 }
  0x8b   : > { %750 = vmatmul.mubr.msk.bf16.vlgmr.msra.gmra.mrb[0].mxu0 %vm247_vm1, %v707_v10  ;;  %v393_v11 = vpop.permute.xlu1 %392  ;;  %v341_v13 = vpop.permute.xlu0 %340 }
  0x8c   : > { %762 = vmatpush3.bf16.msra.mxu0 %v339_v7  ;;  %772 = vmatpush3.bf16.msra.mxu1 %v393_v11 }
  0x8d   : > { %763 = vmatprep.subr.bf16.mxu0 %v831_v0  ;;  %765 = vmatprep.mubr.msk.bf16.mxu0 %vm832_vm0, %v831_v0 }
  0x8e   : > { %785 = vmatprep.subr.bf16.mxu1 %v831_v0 }
  0x8f   : > { %774 = vmatmul.mubr.msk.bf16.vlgmr.msra.gmra.mrb[4].mxu1 %vm247_vm1, %v714_v12 }
  0x90   : > { %764 = vmatpush3.bf16.msra.mxu0 %v341_v13  ;;  %789 = vmatprep.mubr.msk.bf16.mxu1 %vm832_vm0, %v831_v0 }
  0x91   : > { %777 = vmatprep.subr.bf16.mxu0 %v831_v0 }
  0x93   : > { %766 = vmatmul.mubr.msk.bf16.vlgmr.msra.gmra.mrb[4].mxu0 %vm247_vm1, %v712_v14 }
  0x94   : > { %781 = vmatprep.mubr.msk.bf16.mxu0 %vm832_vm0, %v831_v0 }
  0x9c   : > { %v444_v32 = vpop.permute.xlu0 %443 }
  0xed   : > { %v330_v15 = vpop.f32.mrb[0].mxu1 }
  0xee   : > { %v759_v16 = vpop.f32.mrb[1].mxu1 }
  0xef   : > { %v333_v17 = vpop.f32.mrb[2].mxu1 }
  0xf0   : > { %v760_v18 = vpop.f32.mrb[3].mxu1 }
 0x15e   : > { %v285_v19 = vpop.f32.mrb[0].mxu0 }
 0x15f   : > { %v331_v20 = vadd.f32 %v330_v15, %v285_v19  ;;  %v751_v21 = vpop.f32.mrb[1].mxu0 }
 0x160   : > { %v288_v22 = vpop.f32.mrb[2].mxu0 }
 0x161   : > { %v752_v23 = vpop.f32.mrb[3].mxu0 }
 0x162   : > { %v433_v24 = vpop.f32.mrb[4].mxu1 }
 0x163   : > { %v775_v25 = vpop.f32.mrb[5].mxu1 }
 0x164   : > { %v436_v26 = vpop.f32.mrb[6].mxu1 }
 0x165   : > { %v776_v27 = vpop.f32.mrb[7].mxu1 }
 0x166   : > { %v381_v28 = vpop.f32.mrb[4].mxu0 }
 0x167   : > { %v387_v29 = vadd.f32 %v381_v28, %v331_v20  ;;  %v767_v30 = vpop.f32.mrb[5].mxu0 }
 0x168   : > { %v384_v31 = vpop.f32.mrb[6].mxu0 }
 0x169   : > { %v768_v33 = vpop.f32.mrb[7].mxu0  ;;  %v439_v34 = vadd.f32 %v433_v24, %v387_v29 }
 0x16b   : > { %v446_v35 = vadd.f32 %v444_v32, %v439_v34 }
 0x16d   : > { %v447_v36 = vmax.f32 %v446_v35, 0.0 }
 0x16f   : > { %464 = vst.msk [vmem:[#allocation2 + $0x10] sm:$0xff] %vm463_vm3, %v447_v36  ;;  %453 = vrot.lane.b32.xlu1 %v447_v36, %s837_s12 }
 0x173   : > { %458 = vrot.lane.b32.xlu1 %v447_v36, %s838_s13 }
 0x176   : > { %v467_v37 = vld [vmem:[#allocation2 + $0x10] sm:$0xff] }
 0x177   : > { %v469_v38 = vpack.c.bf16 %v467_v37, %v467_v37 }
 0x179   : > { %477 = vrot.lane.b32.xlu1 %v469_v38, %s839_s14 }
 0x1e1   : > { %v454_v39 = vpop.permute.xlu1 %453 }
 0x1e2   : > { %457 = vst.msk [vmem:[#allocation2] sm:$0xff] %vm456_vm4, %v454_v39 }
 0x1e5   : > { %v459_v40 = vpop.permute.xlu1 %458 }
 0x1e6   : > { %462 = vst.msk [vmem:[#allocation2 + $0x8] sm:$0xff] %vm461_vm5, %v459_v40 }
 0x1e9   : > { %v465_v41 = vld [vmem:[#allocation2] sm:$0xff] }
 0x1eb   : > { %v478_v45 = vpop.permute.xlu1 %477 }
 0x1ec   : > { %v486_v48 = vsel %vm484_vm6, %v478_v45, 0 }
 0x1ed   : > { %v466_v42 = vld [vmem:[#allocation2 + $0x8] sm:$0xff] }
 0x1ee   : > { %v468_v43 = vpack.c.bf16 %v466_v42, %v465_v41 }
 0x1f0   : > { %475 = vrot.lane.b32.xlu0 %v468_v43, %s839_s14  ;;  %581 = vrot.lane.b32.xlu1 %v468_v43, %s840_s15 }
 0x1f4   : > { %528 = vrot.lane.b32.xlu0 %v468_v43, %s841_s16  ;;  %583 = vrot.lane.b32.xlu1 %v469_v38, %s840_s15 }
 0x1f8   : > { %530 = vrot.lane.b32.xlu0 %v469_v38, %s841_s16 }
 0x1fc   : > { %636 = vperm.xlu0 %820, %v633_v44  }
 0x262   : > { %v476_v46 = vpop.permute.xlu0 %475  ;;  %v582_v47 = vpop.permute.xlu1 %581 }
 0x263   : > { %778 = vmatpush3.bf16.msra.mxu0 %v476_v46 }
 0x264   : > { %779 = vmatprep.subr.bf16.mxu0 %v831_v0 }
 0x266   : > { %v529_v49 = vpop.permute.xlu0 %528  ;;  %v584_v52 = vpop.permute.xlu1 %583 }
 0x267   : > { %780 = vmatpush3.bf16.msra.mxu0 %v486_v48  ;;  %786 = vmatpush3.bf16.msra.mxu1 %v529_v49  ;;  %v590_v55 = vsel %vm484_vm6, %v584_v52, 0 }
 0x268   : > { %793 = vmatprep.subr.bf16.mxu0 %v831_v0  ;;  %787 = vmatprep.subr.bf16.mxu1 %v831_v0 }
 0x26a   : > { %v531_v51 = vpop.permute.xlu0 %530  ;;  %782 = vmatmul.mubr.msk.bf16.vlgmr.msra.gmra.mrb[8].mxu0 %vm480_vm7, %v716_v50 }
 0x26b   : > { %v537_v53 = vsel %vm484_vm6, %v531_v51, 0  ;;  %794 = vmatpush3.bf16.msra.mxu0 %v582_v47  ;;  %797 = vmatprep.mubr.msk.bf16.mxu0 %vm832_vm0, %v831_v0 }
 0x26c   : > { %788 = vmatpush3.bf16.msra.mxu1 %v537_v53  ;;  %795 = vmatprep.subr.bf16.mxu0 %v831_v0 }
 0x26f   : > { %790 = vmatmul.mubr.msk.bf16.vlgmr.msra.gmra.mrb[8].mxu1 %vm480_vm7, %v470_v54  ;;  %796 = vmatpush3.bf16.msra.mxu0 %v590_v55 }
 0x272   : > { %798 = vmatmul.mubr.msk.bf16.vlgmr.msra.gmra.mrb[12].mxu0 %vm480_vm7, %v719_v56 }
 0x27b   : > { %v637_v6 = vpop.permute.xlu0 %636 }
 0x33d   : > { %v522_v57 = vpop.f32.mrb[8].mxu0 }
 0x33e   : > { %v783_v58 = vpop.f32.mrb[9].mxu0 }
 0x33f   : > { %v525_v59 = vpop.f32.mrb[10].mxu0 }
 0x340   : > { %v784_v60 = vpop.f32.mrb[11].mxu0 }
 0x342   : > { %v573_v61 = vpop.f32.mrb[8].mxu1 }
 0x343   : > { %v574_v62 = vadd.f32 %v573_v61, %v522_v57  ;;  %v791_v63 = vpop.f32.mrb[9].mxu1 }
 0x344   : > { %v576_v0 = vpop.f32.mrb[10].mxu1 }
 0x345   : > { %v792_v1 = vpop.f32.mrb[11].mxu1  ;;  %v626_v2 = vpop.f32.mrb[12].mxu0 }
 0x346   : > { %v632_v4 = vadd.f32 %v626_v2, %v574_v62  ;;  %v799_v5 = vpop.f32.mrb[13].mxu0 }
 0x347   : > { %v629_v7 = vpop.f32.mrb[14].mxu0 }
 0x348   : > { %v639_v8 = vadd.f32 %v637_v6, %v632_v4  ;;  %v800_v9 = vpop.f32.mrb[15].mxu0 }
 0x34a   : > { %v640_v10 = vmax.f32 %v639_v8, 0.0 }
 0x34c   : > { %v641_v11 = vpack.c.bf16 %v640_v10, %v640_v10 }
 0x34e   : > { %643 = vst.msk [vmem:[%s222_s30] sm:$0xf] %vm642_vm8, %v641_v11 }
 0x34f   : > { %645 = vst.msk [vmem:[%s222_s30] sm:$0xf] %vm644_vm9, %v835_v3 }
 0x350 PF: > { %s15_s18 = sadd.s32 1, %s829_s18  }
 0x351   : > { %p12_p4 = scmp.ge.s32.totalorder %s15_s18, 4  }
 0x353   :  { %14 = sbr.rel (!%p12_p4) target bundleno = 1 (0x1), region = 75 }

// kernel: actor_forward.3
= control target key start
LH: loop header
LB: loop body
LE: loop exit
PB: predicated region body
PF: predicated region fallthrough
CT: control target
= control target key end

     0   :  { %21 = vsyncpa [#allocation4], 0  ;;  %v182_v28 = vlaneseq  ;;  %v1476_v36 = vmov 1966171168   ;;  %s1854_s0 = inlined_call_operand.vmem [shape: bf16[2,1024], index: 0, kind: input, shape index: {}]   ;;  %s1855_s1 = inlined_call_operand.vmem [shape: bf16[1024,16], index: 1, kind: input, shape index: {}]   ;;  %s1856_s2 = inlined_call_operand.vmem [shape: f32[1,16], index: 2, kind: input, shape index: {}]   ;;  %s1857_s3 = inlined_call_operand.vmem [shape: f32[1,16], index: 3, kind: input, shape index: {}]   ;;  %s1858_s4 = inlined_call_operand.vmem [shape: f32[1,16], index: 4, kind: input, shape index: {}]   ;;  %s1859_s5 = inlined_call_operand.vmem [shape: bf16[16,32], index: 5, kind: input, shape index: {}]   ;;  %s1860_s6 = inlined_call_operand.vmem [shape: f32[1,32], index: 6, kind: input, shape index: {}]   ;;  %s1861_s7 = inlined_call_operand.vmem [shape: bf16[32,32], index: 7, kind: input, shape index: {}]   ;;  %s1862_s8 = inlined_call_operand.vmem [shape: f32[1,32], index: 8, kind: input, shape index: {}]   ;;  %s1863_s9 = inlined_call_operand.vmem [shape: bf16[32,6], index: 9, kind: input, shape index: {}]   ;;  %s1864_s10 = inlined_call_operand.vmem [shape: f32[1,6], index: 10, kind: input, shape index: {}]   ;;  %s1865_s11 = inlined_call_operand.vmem [shape: f32[2,3], index: 11, kind: input, shape index: {}]   ;;  %s1866_s12 = inlined_call_operand.hbm [shape: f32[2,3], index: 12, kind: output, shape index: {0}]   ;;  %s1867_s13 = inlined_call_operand.hbm [shape: f32[2,3], index: 13, kind: output, shape index: {1}]   ;;  %s1868_s14 = inlined_call_operand.vmem [shape: f32[2,1], index: 14, kind: output, shape index: {2}]   ;;  %s1869_s15 = inlined_call_operand.hbm [shape: f32[2,3], index: 15, kind: output, shape index: {3}]  }
   0x1   :  { %v1324_v0 = vld [vmem:[%s1855_s1 + $0x40] sm:$0xff]   ;;  %v1328_v4 = vld [vmem:[%s1855_s1 + $0x48] sm:$0xff]   ;;  %v1332_v8 = vld [vmem:[%s1855_s1 + $0x50] sm:$0xff]   ;;  %v180_v37 = vunpack.c.l.s4 %v1476_v36 }
   0x2   :  { %v1325_v1 = vld [vmem:[%s1855_s1 + $0xc0] sm:$0xff]   ;;  %1199 = vmatprep.subr.bf16.mxu0 %v1324_v0  ;;  %v1329_v5 = vld [vmem:[%s1855_s1 + $0xc8] sm:$0xff]   ;;  %v1333_v9 = vld [vmem:[%s1855_s1 + $0xd0] sm:$0xff]   ;;  %v183_v33 = vshrl.u32 %v182_v28, 7 }
   0x3   :  { %v1326_v2 = vld [vmem:[%s1855_s1] sm:$0xff]   ;;  %1221 = vmatprep.subr.bf16.mxu1 %v1325_v1  ;;  %v1330_v6 = vld [vmem:[%s1855_s1 + $0x8] sm:$0xff]   ;;  %v1334_v10 = vld [vmem:[%s1855_s1 + $0x10] sm:$0xff]   ;;  %v181_v40 = vunpack.c.0.s8 %v180_v37 }
   0x4   :  { %v1327_v3 = vld [vmem:[%s1855_s1 + $0x80] sm:$0xff]   ;;  %1200 = vmatpush3.bf16.msra.mxu0 %v1326_v2  ;;  %v1331_v7 = vld [vmem:[%s1855_s1 + $0x88] sm:$0xff]   ;;  %v1335_v11 = vld [vmem:[%s1855_s1 + $0x90] sm:$0xff]  }
   0x5   :  { %1222 = vmatpush3.bf16.msra.mxu1 %v1327_v3  ;;  %1201 = vmatprep.subr.bf16.mxu0 %v1328_v4  ;;  %v1336_v12 = vld [vmem:[%s1855_s1 + $0x58] sm:$0xff]   ;;  %v1340_v16 = vld [vmem:[%s1855_s1 + $0x60] sm:$0xff]   ;;  %v1344_v20 = vld [vmem:[%s1855_s1 + $0x68] sm:$0xff]   ;;  %v1668_v41 = vsub.s32 %v181_v40, %v183_v33 }
   0x6   :  { %1223 = vmatprep.subr.bf16.mxu1 %v1329_v5  ;;  %v1337_v13 = vld [vmem:[%s1855_s1 + $0xd8] sm:$0xff]   ;;  %v1341_v17 = vld [vmem:[%s1855_s1 + $0xe0] sm:$0xff]   ;;  %v1345_v21 = vld [vmem:[%s1855_s1 + $0xe8] sm:$0xff]  }
   0x7   :  { %v1338_v14 = vld [vmem:[%s1855_s1 + $0x18] sm:$0xff]   ;;  %v1342_v18 = vld [vmem:[%s1855_s1 + $0x20] sm:$0xff]   ;;  %v1346_v22 = vld [vmem:[%s1855_s1 + $0x28] sm:$0xff]  }
   0x8   :  { %1202 = vmatpush3.bf16.msra.mxu0 %v1330_v6  ;;  %v1339_v15 = vld [vmem:[%s1855_s1 + $0x98] sm:$0xff]   ;;  %v1343_v19 = vld [vmem:[%s1855_s1 + $0xa0] sm:$0xff]   ;;  %v1347_v23 = vld [vmem:[%s1855_s1 + $0xa8] sm:$0xff]  }
   0x9   :  { %1224 = vmatpush3.bf16.msra.mxu1 %v1331_v7  ;;  %1203 = vmatprep.subr.bf16.mxu0 %v1332_v8  ;;  %v1348_v24 = vld [vmem:[%s1855_s1 + $0x70] sm:$0xff]   ;;  %v1352_v29 = vld [vmem:[%s1855_s1 + $0x78] sm:$0xff]   ;;  %v48_v34 = vld [vmem:[%s1854_s0] sm:$0xff] }
   0xa   :  { %1225 = vmatprep.subr.bf16.mxu1 %v1333_v9  ;;  %v1349_v25 = vld [vmem:[%s1855_s1 + $0xf0] sm:$0xff]   ;;  %v1353_v30 = vld [vmem:[%s1855_s1 + $0xf8] sm:$0xff]   ;;  %v1357_v35 = vld [vmem:[%s1855_s1 + $0x140] sm:$0xff]   ;;  %v178_v39 = vcombine.high %v48_v34, %v48_v34  ;;  %v185_v42 = vrot.slane %v48_v34, %v1668_v41 }
   0xb   :  { %v1350_v26 = vld [vmem:[%s1855_s1 + $0x30] sm:$0xff]   ;;  %v1354_v31 = vld [vmem:[%s1855_s1 + $0x38] sm:$0xff]   ;;  %v1358_v38 = vld [vmem:[%s1855_s1 + $0x1c0] sm:$0xff]  }
   0xc   :  { %1204 = vmatpush3.bf16.msra.mxu0 %v1334_v10  ;;  %v1351_v27 = vld [vmem:[%s1855_s1 + $0xb0] sm:$0xff]   ;;  %v1355_v32 = vld [vmem:[%s1855_s1 + $0xb8] sm:$0xff]   ;;  %v1672_v43 = vrot.slane %v178_v39, %v1668_v41  ;;  %v193_v44 = vcombine.high %v185_v42, %v185_v42  ;;  %v201_v45 = vrot.slane %v185_v42, %v1668_v41  ;;  %v1359_v47 = vld [vmem:[%s1855_s1 + $0x100] sm:$0xff]  }
   0xd   :  { %1226 = vmatpush3.bf16.msra.mxu1 %v1335_v11  ;;  %1205 = vmatprep.subr.bf16.mxu0 %v1336_v12  ;;  %v1360_v49 = vld [vmem:[%s1855_s1 + $0x180] sm:$0xff]   ;;  %v1361_v52 = vld [vmem:[%s1855_s1 + $0x148] sm:$0xff]   ;;  %v1365_v58 = vld [vmem:[%s1855_s1 + $0x150] sm:$0xff]  }
   0xe   :  { %1227 = vmatprep.subr.bf16.mxu1 %v1337_v13  ;;  %v194_v46 = vcombine.high %v1672_v43, %v1672_v43  ;;  %v215_v48 = vrot.slane %v193_v44, %v1668_v41  ;;  %v223_v51 = vcombine.high %v201_v45, %v201_v45  ;;  %v1362_v54 = vld [vmem:[%s1855_s1 + $0x1c8] sm:$0xff]   ;;  %v1366_v59 = vld [vmem:[%s1855_s1 + $0x1d0] sm:$0xff]   ;;  %v1369_v62 = vld [vmem:[%s1855_s1 + $0x158] sm:$0xff]  }
   0xf   :  { %v1363_v55 = vld [vmem:[%s1855_s1 + $0x108] sm:$0xff]   ;;  %v1367_v60 = vld [vmem:[%s1855_s1 + $0x110] sm:$0xff]   ;;  %v1370_v63 = vld [vmem:[%s1855_s1 + $0x1d8] sm:$0xff]  }
  0x10   :  { %1206 = vmatpush3.bf16.msra.mxu0 %v1338_v14  ;;  %v222_v50 = vrot.slane %v194_v46, %v1668_v41  ;;  %651 = vmatprep.mubr.bf16.mxu0 %v215_v48  ;;  %v225_v53 = vcombine.high %v215_v48, %v215_v48  ;;  %v1364_v57 = vld [vmem:[%s1855_s1 + $0x188] sm:$0xff]   ;;  %v1368_v61 = vld [vmem:[%s1855_s1 + $0x190] sm:$0xff]   ;;  %v1371_v0 = vld [vmem:[%s1855_s1 + $0x118] sm:$0xff]  }
  0x11   :  { %1228 = vmatpush3.bf16.msra.mxu1 %v1339_v15  ;;  %1207 = vmatprep.subr.bf16.mxu0 %v1340_v16  ;;  %v1372_v1 = vld [vmem:[%s1855_s1 + $0x198] sm:$0xff]   ;;  %v1373_v2 = vld [vmem:[%s1855_s1 + $0x160] sm:$0xff]   ;;  %v1377_v6 = vld [vmem:[%s1855_s1 + $0x168] sm:$0xff]  }
  0x12   :  { %1229 = vmatprep.subr.bf16.mxu1 %v1341_v17  ;;  %v226_v56 = vcombine.high %v222_v50, %v222_v50  ;;  %691 = vmatprep.mubr.bf16.mxu1 %v225_v53  ;;  %v1374_v3 = vld [vmem:[%s1855_s1 + $0x1e0] sm:$0xff]   ;;  %v1378_v7 = vld [vmem:[%s1855_s1 + $0x1e8] sm:$0xff]   ;;  %v1381_v10 = vld [vmem:[%s1855_s1 + $0x170] sm:$0xff]  }
  0x13   :  { %v1375_v4 = vld [vmem:[%s1855_s1 + $0x120] sm:$0xff]   ;;  %v1379_v8 = vld [vmem:[%s1855_s1 + $0x128] sm:$0xff]   ;;  %v1382_v11 = vld [vmem:[%s1855_s1 + $0x1f0] sm:$0xff]  }
  0x14   :  { %1208 = vmatpush3.bf16.msra.mxu0 %v1342_v18  ;;  %v1376_v5 = vld [vmem:[%s1855_s1 + $0x1a0] sm:$0xff]   ;;  %v1380_v9 = vld [vmem:[%s1855_s1 + $0x1a8] sm:$0xff]   ;;  %v1383_v12 = vld [vmem:[%s1855_s1 + $0x130] sm:$0xff]  }
  0x15   :  { %1230 = vmatpush3.bf16.msra.mxu1 %v1343_v19  ;;  %1209 = vmatprep.subr.bf16.mxu0 %v1344_v20 }
  0x16   :  { %1231 = vmatprep.subr.bf16.mxu1 %v1345_v21 }
  0x18   :  { %1210 = vmatpush3.bf16.msra.mxu0 %v1346_v22 }
  0x19   :  { %1232 = vmatpush3.bf16.msra.mxu1 %v1347_v23  ;;  %1211 = vmatprep.subr.bf16.mxu0 %v1348_v24 }
  0x1a   :  { %1233 = vmatprep.subr.bf16.mxu1 %v1349_v25 }
  0x1c   :  { %1212 = vmatpush3.bf16.msra.mxu0 %v1350_v26 }
  0x1d   :  { %1234 = vmatpush3.bf16.msra.mxu1 %v1351_v27  ;;  %1213 = vmatprep.subr.bf16.mxu0 %v1352_v29 }
  0x1e   :  { %1235 = vmatprep.subr.bf16.mxu1 %v1353_v30 }
  0x20   :  { %1214 = vmatpush3.bf16.msra.mxu0 %v1354_v31 }
  0x21   :  { %1236 = vmatpush3.bf16.msra.mxu1 %v1355_v32  ;;  %1243 = vmatprep.subr.bf16.mxu0 %v1357_v35 }
  0x22   :  { %1265 = vmatprep.subr.bf16.mxu1 %v1358_v38 }
  0x23   :  { %652 = vmatmul.mubr.bf16.vlgmr.msra.gmra.mrb[0].mxu0 %v201_v45 }
  0x24   :  { %1244 = vmatpush3.bf16.msra.mxu0 %v1359_v47  ;;  %692 = vmatmul.mubr.bf16.vlgmr.msra.gmra.mrb[0].mxu1 %v223_v51 }
  0x25   :  { %1245 = vmatprep.subr.bf16.mxu0 %v1361_v52  ;;  %1266 = vmatpush3.bf16.msra.mxu1 %v1360_v49 }
  0x26   :  { %731 = vmatprep.mubr.bf16.mxu0 %v222_v50  ;;  %1267 = vmatprep.subr.bf16.mxu1 %v1362_v54 }
  0x27   :  { %771 = vmatprep.mubr.bf16.mxu1 %v226_v56 }
  0x28   :  { %1246 = vmatpush3.bf16.msra.mxu0 %v1363_v55 }
  0x29   :  { %1247 = vmatprep.subr.bf16.mxu0 %v1365_v58  ;;  %1268 = vmatpush3.bf16.msra.mxu1 %v1364_v57 }
  0x2a   :  { %1269 = vmatprep.subr.bf16.mxu1 %v1366_v59 }
  0x2c   :  { %1248 = vmatpush3.bf16.msra.mxu0 %v1367_v60 }
  0x2d   :  { %1249 = vmatprep.subr.bf16.mxu0 %v1369_v62  ;;  %1270 = vmatpush3.bf16.msra.mxu1 %v1368_v61 }
  0x2e   :  { %1271 = vmatprep.subr.bf16.mxu1 %v1370_v63 }
  0x30   :  { %1250 = vmatpush3.bf16.msra.mxu0 %v1371_v0 }
  0x31   :  { %1251 = vmatprep.subr.bf16.mxu0 %v1373_v2  ;;  %1272 = vmatpush3.bf16.msra.mxu1 %v1372_v1 }
  0x32   :  { %1273 = vmatprep.subr.bf16.mxu1 %v1374_v3 }
  0x34   :  { %1252 = vmatpush3.bf16.msra.mxu0 %v1375_v4 }
  0x35   :  { %1253 = vmatprep.subr.bf16.mxu0 %v1377_v6  ;;  %1274 = vmatpush3.bf16.msra.mxu1 %v1376_v5 }
  0x36   :  { %1275 = vmatprep.subr.bf16.mxu1 %v1378_v7 }
  0x38   :  { %1254 = vmatpush3.bf16.msra.mxu0 %v1379_v8 }
  0x39   :  { %22 = vsyncpa [#allocation6], 0  ;;  %1255 = vmatprep.subr.bf16.mxu0 %v1381_v10  ;;  %v1385_v13 = vld [vmem:[%s1855_s1 + $0x178] sm:$0xff]   ;;  %1276 = vmatpush3.bf16.msra.mxu1 %v1380_v9  ;;  %v1384_v14 = vld [vmem:[%s1855_s1 + $0x1b0] sm:$0xff]   ;;  %v208_v17 = vrot.slane %v1672_v43, %v1668_v41  ;;  %vm783_vm0 = vcmask 123904   ;;  %v1477_v53 = vmov 0.0  }
  0x3a   :  { %1277 = vmatprep.subr.bf16.mxu1 %v1382_v11  ;;  %v1386_v15 = vld [vmem:[%s1855_s1 + $0x1f8] sm:$0xff]   ;;  %v1184_v43 = vld [vmem:[%s1856_s2] ss:$0 sm:$0xff]  ;;  %vm1478_vm1 = vmmov 0   ;;  %vm853_vm2 = vcmask 130048   ;;  %v1391_v2 = vld [vmem:[%s1861_s7 + $0x8] sm:$0xff]  }
  0x3b   :  { %v1387_v16 = vld [vmem:[%s1855_s1 + $0x138] sm:$0xff]   ;;  %v224_v19 = vcombine.high %v208_v17, %v208_v17  ;;  %v1389_v52 = vld [vmem:[%s1859_s5] sm:$0xff]   ;;  %vm922_vm3 = vcmask 261120   ;;  %vm1054_vm4 = vcmask 17408  }
  0x3c   :  { %1256 = vmatpush3.bf16.msra.mxu0 %v1383_v12  ;;  %v1388_v18 = vld [vmem:[%s1855_s1 + $0x1b8] sm:$0xff]   ;;  %v1390_v54 = vld [vmem:[%s1861_s7] sm:$0xff]   ;;  %v1393_v12 = vld [vmem:[%s1863_s9 + $0x8] sm:$0xff]   ;;  %s1481_s1 = smov [#allocation3]  }
  0x3d   :  { %1257 = vmatprep.subr.bf16.mxu0 %v1385_v13  ;;  %1278 = vmatpush3.bf16.msra.mxu1 %v1384_v14  ;;  %v1185_v59 = vld [vmem:[%s1857_s3] ss:$0 sm:$0xff]  ;;  %s1081_s24 = sshll.u32 %s1481_s1, 4  ;;  %s1082_s24 = int_to_ptr.vmem [resolvable:$true] %s1081_s24 }
  0x3e   :  { %1279 = vmatprep.subr.bf16.mxu1 %v1386_v15  ;;  %v1186_v61 = vld [vmem:[%s1858_s4] ss:$0 sm:$0xff] }
  0x3f   :  { %v1392_v3 = vld [vmem:[%s1863_s9] sm:$0xff]  }
  0x40   :  { %1258 = vmatpush3.bf16.msra.mxu0 %v1387_v16  ;;  %v1187_v4 = vld [vmem:[%s1860_s6] ss:$0 sm:$0xff] }
  0x41   :  { %1280 = vmatpush3.bf16.msra.mxu1 %v1388_v18  ;;  %1295 = vmatprep.subr.bf16.mxu0 %v1477_v53  ;;  %v1190_v13 = vld [vmem:[%s1862_s8] ss:$0 sm:$0xff]  ;;  %s1479_s8 = smov 125  }
  0x42   :  { %1301 = vmatprep.subr.bf16.mxu1 %v1477_v53 }
  0x43   :  { %732 = vmatmul.mubr.bf16.vlgmr.msra.gmra.mrb[4].mxu0 %v208_v17 }
  0x44   :  { %772 = vmatmul.mubr.bf16.vlgmr.msra.gmra.mrb[4].mxu1 %v224_v19  ;;  %1297 = vmatprep.mubr.msk.bf16.mxu0 %vm1478_vm1, %v1477_v53 }
  0x45   :  { %1296 = vmatpush3.bf16.msra.mxu0 %v1389_v52  ;;  %1305 = vmatprep.mubr.msk.bf16.mxu1 %vm1478_vm1, %v1477_v53 }
  0x46   :  { %1309 = vmatprep.subr.bf16.mxu0 %v1477_v53  ;;  %1302 = vmatpush3.bf16.msra.mxu1 %v1390_v54 }
  0x47   :  { %1303 = vmatprep.subr.bf16.mxu1 %v1477_v53 }
  0x4a   :  { %1304 = vmatpush3.bf16.msra.mxu1 %v1391_v2 }
  0xf6   :  { %v1215_v20 = vpop.f32.mrb[0].mxu0 }
  0xf7   :  { %v1216_v21 = vpop.f32.mrb[1].mxu0  ;;  %v1237_v22 = vpop.f32.mrb[0].mxu1 }
  0xf8   :  { %v1217_v23 = vadd.f32 %v1216_v21, %v1215_v20  ;;  %v1218_v24 = vpop.f32.mrb[2].mxu0  ;;  %v1238_v25 = vpop.f32.mrb[1].mxu1  ;;  %v1194_v21 = vld [vmem:[%s1864_s10] ss:$0 sm:$0xff] }
  0xf9   :  { %v1219_v26 = vpop.f32.mrb[3].mxu0  ;;  %v1239_v27 = vadd.f32 %v1238_v25, %v1237_v22  ;;  %v1240_v28 = vpop.f32.mrb[2].mxu1 }
  0xfa   :  { %v1241_v29 = vpop.f32.mrb[3].mxu1 }
  0xfb   :  { %v694_v30 = vadd.f32 %v1239_v27, %v1217_v23 }
 0x116   :  { %v1259_v31 = vpop.f32.mrb[4].mxu0 }
 0x117   :  { %v1260_v32 = vpop.f32.mrb[5].mxu0  ;;  %v1281_v33 = vpop.f32.mrb[4].mxu1 }
 0x118   :  { %v1261_v34 = vadd.f32 %v1260_v32, %v1259_v31  ;;  %v1262_v35 = vpop.f32.mrb[6].mxu0  ;;  %v1282_v36 = vpop.f32.mrb[5].mxu1 }
 0x119   :  { %v1263_v37 = vpop.f32.mrb[7].mxu0  ;;  %v1283_v39 = vadd.f32 %v1282_v36, %v1281_v33  ;;  %v1284_v40 = vpop.f32.mrb[6].mxu1  ;;  %v1038_v33 = vld [vmem:[%s1865_s11] sm:$0x3]  ;;  %s1480_s11 = smov [#allocation5]  }
 0x11a   :  { %v734_v38 = vadd.f32 %v1261_v34, %v694_v30  ;;  %v1285_v41 = vpop.f32.mrb[7].mxu1  ;;  %v1047_v34 = vmul.f32 -0.5, %v1038_v33  ;;  %s1091_s23 = sshll.u32 %s1480_s11, 4  ;;  %s1092_s23 = int_to_ptr.vmem [resolvable:$true] %s1091_s23 }
 0x11b   :  { %s1406_s25 = scalar_lea.vmem %s1092_s23, 32  ;;  %p1411_p1 = scmp.lt.s32.totalorder %s1092_s23, %s1092_s23 }
 0x11c   :  { %v774_v42 = vadd.f32 %v1283_v39, %v734_v38  ;;  %v1048_v37 = vmul.f32 %v1047_v34, %v1038_v33  ;;  %p1407_p0 = scmp.ne.s32.totalorder %s1092_s23, %s1406_s25  ;;  %p1412_p2 = scmp.lt.s32.totalorder %s1406_s25, %s1406_s25 }
 0x11e   :  { %784 = vst.msk [vmem:[#allocation2] sm:$0x3] %vm783_vm0, %v774_v42  ;;  %p1413_p3 = por %p1412_p2, %p1411_p1 }
 0x120   :  { %p1414_p4 = pnand %p1413_p3, %p1407_p0 }
 0x125   :  { %v796_v44 = vld [vmem:[#allocation2] sm:$0x3] }
 0x126   :  { %v804_v45 = vadd.f32 %v1184_v43, %v796_v44 }
 0x128   :  { %v806_v46 = vsel %vm783_vm0, %v804_v45, 0.0 }
 0x129   :  { %807 = vadd.xlane.f32.xlu0 %v806_v46 }
 0x1b6   :  { %v808_v47 = vpop.xlane.xlu0 %807 }
 0x1b7   :  { %v810_v48 = vmul.f32 0.0625, %v808_v47 }
 0x1b9   :  { %v811_v49 = vsub.f32 %v804_v45, %v810_v48 }
 0x1bb   :  { %v812_v50 = vmul.f32 %v811_v49, %v811_v49 }
 0x1bd   :  { %v813_v51 = vsel %vm783_vm0, %v812_v50, 0.0 }
 0x1be   :  { %814 = vadd.xlane.f32.xlu0 %v813_v51 }
 0x24b   :  { %v815_v55 = vpop.xlane.xlu0 %814 }
 0x24c   :  { %v816_v56 = vmul.f32 0.0625, %v815_v55 }
 0x24e   :  { %v817_v57 = vadd.f32 1e-05, %v816_v56 }
 0x250   :  { %1394 = vrsqrt.f32 %v817_v57 }
 0x25a   :  { %v1395_v58 = vpop.eup %1394 }
 0x25b   :  { %v819_v60 = vmul.f32 %v1395_v58, %v811_v49 }
 0x25d   :  { %v827_v62 = vmul.f32 %v1185_v59, %v819_v60 }
 0x25f   :  { %v835_v63 = vadd.f32 %v1186_v61, %v827_v62 }
 0x261   :  { %1396 = vtanh.f32 %v835_v63 }
 0x26b   :  { %v1397_v0 = vpop.eup %1396 }
 0x26c   :  { %v837_v1 = vpack.c.bf16 %v1397_v0, %v1397_v0 }
 0x26e   :  { %1298 = vmatmul.mubr.msk.bf16.vlgmr.msra.gmra.mrb[8].mxu0 %vm853_vm2, %v837_v1 }
 0x26f   :  { %1313 = vmatprep.mubr.msk.bf16.mxu0 %vm1478_vm1, %v1477_v53  ;;  %1310 = vmatpush3.bf16.msra.mxu0 %v1392_v3 }
 0x270   :  { %1311 = vmatprep.subr.bf16.mxu0 %v1477_v53 }
 0x273   :  { %1312 = vmatpush3.bf16.msra.mxu0 %v1393_v12 }
 0x341   :  { %v891_v5 = vpop.f32.mrb[8].mxu0 }
 0x342   :  { %v892_v6 = vadd.f32 %v1187_v4, %v891_v5  ;;  %v1299_v7 = vpop.f32.mrb[9].mxu0 }
 0x343   :  { %v894_v8 = vpop.f32.mrb[10].mxu0 }
 0x344   :  { %v897_v9 = vmax.f32 %v892_v6, 0.0  ;;  %v1300_v10 = vpop.f32.mrb[11].mxu0 }
 0x346   :  { %v898_v11 = vpack.c.bf16 %v897_v9, %v897_v9 }
 0x348   :  { %1306 = vmatmul.mubr.msk.bf16.vlgmr.msra.gmra.mrb[8].mxu1 %vm922_vm3, %v898_v11 }
 0x41b   :  { %v960_v14 = vpop.f32.mrb[8].mxu1 }
 0x41c   :  { %v961_v15 = vadd.f32 %v1190_v13, %v960_v14  ;;  %v1307_v16 = vpop.f32.mrb[9].mxu1 }
 0x41d   :  { %v963_v17 = vpop.f32.mrb[10].mxu1 }
 0x41e   :  { %v966_v18 = vmax.f32 %v961_v15, 0.0  ;;  %v1308_v19 = vpop.f32.mrb[11].mxu1 }
 0x420   :  { %v967_v20 = vpack.c.bf16 %v966_v18, %v966_v18 }
 0x422   :  { %1314 = vmatmul.mubr.msk.bf16.vlgmr.msra.gmra.mrb[12].mxu0 %vm922_vm3, %v967_v20 }
 0x4f5   :  { %v1028_v22 = vpop.f32.mrb[12].mxu0 }
 0x4f6   :  { %v1029_v23 = vadd.f32 %v1194_v21, %v1028_v22  ;;  %v1315_v24 = vpop.f32.mrb[13].mxu0 }
 0x4f7   :  { %v1031_v25 = vpop.f32.mrb[14].mxu0 }
 0x4f8   :  { %1398 = vtanh.f32 %v1029_v23  ;;  %v1316_v26 = vpop.f32.mrb[15].mxu0 }
 0x502   :  { %v1399_v27 = vpop.eup %1398 }
 0x503   :  { %v1035_v28 = vadd.f32 1.0, %v1399_v27  ;;  %1070 = vst.msk [vmem:[#allocation3] sm:$0x3] %vm1054_vm4, %v1399_v27 }
 0x505   :  { %v1036_v29 = vmul.f32 6.0, %v1035_v28 }
 0x507   :  { %v1037_v30 = vadd.f32 -10.0, %v1036_v29 }
 0x509   :  { %v1039_v31 = vmul.f32 1.442695, %v1037_v30 }
 0x50b   :  { %1400 = vpow2.f32 %v1039_v31 }
 0x515   :  { %v1401_v32 = vpop.eup %1400 }
 0x516   :  { %1042 = vrot.lane.b32.xlu1 %v1401_v32, %s1479_s8 }
 0x51a   :  { %1050 = vrot.lane.b32.xlu1 %v1037_v30, %s1479_s8 }
 0x588   :  { %v1043_v35 = vpop.permute.xlu1 %1042 }
 0x589   :  { %v1045_v36 = vmul.f32 %v1043_v35, %v1038_v33 }
 0x58b   :  { %v1046_v38 = vadd.f32 %v1045_v36, %v1029_v23 }
 0x58c   :  { %v1051_v39 = vpop.permute.xlu1 %1050 }
 0x58d   :  { %1402 = vtanh.f32 %v1046_v38  ;;  %v1053_v40 = vsub.f32 %v1048_v37, %v1051_v39  ;;  %1074 = vst.msk [vmem:[#allocation7] sm:$0x3] %vm1054_vm4, %v1051_v39 }
 0x58f   :  { %v1055_v41 = vsel %vm1054_vm4, %v1053_v40, 0.0 }
 0x590   :  { %1056 = vadd.xlane.f32.xlu0 %v1055_v41 }
 0x597   :  { %v1403_v42 = vpop.eup %1402 }
 0x598   :  { %1071 = vst.msk [vmem:[#allocation5] sm:$0x3] %vm1054_vm4, %v1403_v42  ;;  %v1060_v43 = vmul.f32 %v1403_v42, %v1403_v42 }
 0x59a   :  { %v1061_v44 = vsub.f32 1.0, %v1060_v43 }
 0x59c   :  { %v1062_v45 = vmax.f32 %v1061_v44, 0.0 }
 0x59e   :  { %v1063_v46 = vadd.f32 1e-06, %v1062_v45 }
 0x5a0   :  { %1404 = vlog2.f32 %v1063_v46 }
 0x5aa   :  { %v1405_v47 = vpop.eup %1404 }
 0x5ab   :  { %v1065_v48 = vmul.f32 0.6931472, %v1405_v47 }
 0x5ad   :  { %v1066_v49 = vsel %vm1054_vm4, %v1065_v48, 0.0 }
 0x5ae   :  { %1067 = vadd.xlane.f32.xlu1 %v1066_v49 }
 0x5af   :  { %1417 = shalt.err (!%p1414_p4)
}
 0x5b0   :  { %s1418_s27 = scalar_lea.hbm %s1867_s13, 32 }
 0x5b1   :  { %p1419_p5 = scmp.ne.s32.totalorder %s1867_s13, %s1418_s27  ;;  %p1422_p6 = scmp.lt.u32.totalorder %s1418_s27, %s1867_s13 }
 0x5b3   :  { %p1424_p7 = pnand %p1422_p6, %p1419_p5 }
 0x5b5   :  { %1427 = shalt.err (!%p1424_p7)
}
 0x5b6   :  { %1094 = dma.vmem_to_hbm [thread:$0]  %s1092_s23, 32, %s1867_s13, [#allocation6]  }
 0x5b7   :  { %s1428_s3 = scalar_lea.vmem %s1082_s24, 32  ;;  %p1433_p9 = scmp.lt.s32.totalorder %s1082_s24, %s1082_s24 }
 0x5b8   :  { %p1429_p8 = scmp.ne.s32.totalorder %s1082_s24, %s1428_s3  ;;  %p1434_p10 = scmp.lt.s32.totalorder %s1428_s3, %s1428_s3 }
 0x5ba   :  { %p1435_p11 = por %p1434_p10, %p1433_p9 }
 0x5bc   :  { %p1436_p12 = pnand %p1435_p11, %p1429_p8 }
 0x5be   :  { %1439 = shalt.err (!%p1436_p12)
}
 0x5bf   :  { %s1440_s18 = scalar_lea.hbm %s1866_s12, 32 }
 0x5c0   :  { %p1441_p13 = scmp.ne.s32.totalorder %s1866_s12, %s1440_s18  ;;  %p1444_p0 = scmp.lt.u32.totalorder %s1440_s18, %s1866_s12 }
 0x5c2   :  { %p1446_p1 = pnand %p1444_p0, %p1441_p13 }
 0x5c4   :  { %1449 = shalt.err (!%p1446_p1)
}
 0x5c5   :  { %1084 = dma.vmem_to_hbm [thread:$0]  %s1082_s24, 32, %s1866_s12, [#allocation4]  }
 0x5c6   :  { %s1482_s22 = smov [#allocation7]  }
 0x5c7   :  { %s1103_s8 = sshll.u32 %s1482_s22, 4  ;;  %s1104_s8 = int_to_ptr.vmem [resolvable:$true] %s1103_s8 }
 0x5c8   :  { %s1450_s9 = scalar_lea.vmem %s1104_s8, 32  ;;  %p1455_p3 = scmp.lt.s32.totalorder %s1104_s8, %s1104_s8 }
 0x5c9   :  { %p1451_p2 = scmp.ne.s32.totalorder %s1104_s8, %s1450_s9  ;;  %p1456_p4 = scmp.lt.s32.totalorder %s1450_s9, %s1450_s9 }
 0x5cb   :  { %p1457_p5 = por %p1456_p4, %p1455_p3 }
 0x5cd   :  { %p1458_p6 = pnand %p1457_p5, %p1451_p2 }
 0x5cf   :  { %1461 = shalt.err (!%p1458_p6)
}
 0x5d0   :  { %s1462_s23 = scalar_lea.hbm %s1869_s15, 32 }
 0x5d1   :  { %p1463_p7 = scmp.ne.s32.totalorder %s1869_s15, %s1462_s23  ;;  %p1466_p8 = scmp.lt.u32.totalorder %s1462_s23, %s1869_s15 }
 0x5d3   :  { %p1468_p9 = pnand %p1466_p8, %p1463_p7 }
 0x5d5   :  { %1471 = shalt.err (!%p1468_p9)
}
 0x5d6   :  { %1106 = dma.vmem_to_hbm [thread:$0]  %s1104_s8, 32, %s1869_s15, [#allocation6]   ;;  %vm1072_vm5 = vcmask 1024  }
 0x61d   :  { %v1057_v50 = vpop.xlane.xlu0 %1056 }
 0x61e   :  { %v1198_v51 = vadd.f32 -2.7568157, %v1057_v50 }
 0x63b   :  { %v1068_v52 = vpop.xlane.xlu1 %1067 }
 0x63c   :  { %v1069_v53 = vsub.f32 %v1198_v51, %v1068_v52 }
 0x63e   :  { %1073 = vst.msk [vmem:[%s1868_s14] sm:$0x3] %vm1072_vm5, %v1069_v53 }
 0x63f   :  { %1472 = dma.done.wait [#allocation4], 32  }
 0x640   :  { %1473 = vsyncadd [#allocation4], 4294967264 }
 0x641   :  { %1474 = dma.done.wait [#allocation6], 64  }
 0x642   :  { %1475 = vsyncadd [#allocation6], 4294967232 }
 0x643   :  { %1118 = vsyncpa [#allocation4], 1 }
 0x644   :  { %1119 = vsyncpa [#allocation6], 1 }

</bundles_post_ra>
